<compile_context>
chip_gen: v6e
topology: v6e:2x2x1
jax: 0.10.0
libtpu: 0.0.40
codegen_flags: <defaults>
</compile_context>

<pallas_src>
import math
import jax
import jax.numpy as jnp
from jax.experimental import pallas as pl
from jax.experimental.pallas import tpu as pltpu

# ---- model dims (scaled-down but structurally identical to the module) ----
D_MODEL = 128
D_K = D_V = 32
N_HEADS = 4          # n_heads * d_k == d_model, as in the original (8*64=512)
D_FF = 256
LN_EPS = 1e-5


def _layer_norm(x):
    # nn.LayerNorm(d_model) with default weight=1, bias=0, eps=1e-5
    mean = jnp.mean(x, axis=-1, keepdims=True)
    var = jnp.mean((x - mean) ** 2, axis=-1, keepdims=True)
    return (x - mean) * jax.lax.rsqrt(var + LN_EPS)


def _encoder_layer_kernel(x_ref, mask_ref, bias_ref,
                          wqkv_ref, wo_ref, w1_ref, w2_ref,
                          out_ref, *attn_out_refs):
    # One batch element per grid step (grid axis 0 == batch, "parallel").
    #   x_ref:    (1, S, D)
    #   mask_ref: (1, S, S)        1.0 == masked
    #   bias_ref: (1, H, S, S)
    #   wqkv_ref: (D, H*3*d_k)     head-major: columns [Qh | Kh | Vh] per head
    #   wo_ref:   (H, d_v, D)
    #   w1_ref:   (D, d_ff); w2_ref: (d_ff, D)
    #   out_ref:  (1, S, D)
    #   attn_out_refs: optionally a single (1, H, S, S) ref
    H = bias_ref.shape[1]
    d_k = wqkv_ref.shape[1] // (3 * H)

    x = x_ref[0]                                                   # (S, D)

    # fused QKV projection: one MXU matmul against the resident weight slab
    qkv = jnp.dot(x, wqkv_ref[...],
                  preferred_element_type=jnp.float32)              # (S, 3*H*d_k)

    # one contiguous 96-lane slice per head (head-major layout), then a single
    # Q/K/V split on the stacked (H, S, 3*d_k) buffer.
    qkv_h = jnp.stack(
        [qkv[:, h * 3 * d_k:(h + 1) * 3 * d_k] for h in range(H)], axis=0)
    q = qkv_h[:, :, :d_k]                                          # (H, S, d_k)
    k = qkv_h[:, :, d_k:2 * d_k]                                   # (H, S, d_k)
    v = qkv_h[:, :, 2 * d_k:3 * d_k]                               # (H, S, d_v)

    # additive mask folded into the bias once (not per head)
    mask_add = jnp.where(mask_ref[0] > 0.5,
                         jnp.float32(-1e9), jnp.float32(0.0))      # (S, S)
    bias_m = bias_ref[0] + mask_add[None, :, :]                    # (H, S, S)

    scale = jnp.float32(1.0 / math.sqrt(d_k))

    # single head-batched score matmul (contract on last dims, no transpose)
    scores = jax.lax.dot_general(
        q, k, dimension_numbers=(((2,), (2,)), ((0,), (0,))),
        preferred_element_type=jnp.float32)                        # (H, S, S)
    scores = scores * scale + bias_m

    # numerically stable softmax; exact reciprocal (attn is a checked output)
    m = jnp.max(scores, axis=-1, keepdims=True)
    e = jnp.exp(scores - m)
    attn = e * pl.reciprocal(jnp.sum(e, axis=-1, keepdims=True))   # (H, S, S)

    if attn_out_refs:                                              # optional output
        attn_out_refs[0][0] = attn

    # head-batched context, then W_O as a head-batched matmul + sum over heads
    # (mathematically identical to concat(ctx_h) @ W_O, but no lane concat).
    ctx = jax.lax.dot_general(
        attn, v, dimension_numbers=(((2,), (1,)), ((0,), (0,))),
        preferred_element_type=jnp.float32)                        # (H, S, d_v)
    out_h = jax.lax.dot_general(
        ctx, wo_ref[...], dimension_numbers=(((2,), (1,)), ((0,), (0,))),
        preferred_element_type=jnp.float32)                        # (H, S, D)
    attn_out = jnp.sum(out_h, axis=0)                              # (S, D)

    # residual + LayerNorm
    h1 = _layer_norm(attn_out + x)

    # position-wise FFN: Linear -> ReLU -> Linear, residual + LayerNorm
    ff = jnp.maximum(
        jnp.dot(h1, w1_ref[...], preferred_element_type=jnp.float32), 0.0)
    ff = jnp.dot(ff, w2_ref[...], preferred_element_type=jnp.float32)
    out_ref[0] = _layer_norm(ff + h1)


def encoder_layer(x, attn_mask, md_bias, params, *, return_attn=True):
    """x: (B,S,D) f32, attn_mask: (B,S,S) f32 (1.0==masked), md_bias: (B,H,S,S)."""
    B, S, D = x.shape
    H = md_bias.shape[1]
    d_k = params["wq"].shape[1] // H
    d_v = params["wv"].shape[1] // H
    d_ff = params["w1"].shape[1]

    # head-major fused QKV weights: column block h*3*d_k:(h+1)*3*d_k = [Qh|Kh|Vh]
    w_qkv = jnp.concatenate(
        [params["wq"].reshape(D, H, d_k),
         params["wk"].reshape(D, H, d_k),
         params["wv"].reshape(D, H, d_v)], axis=-1).reshape(D, H * 3 * d_k)
    wo3 = params["wo"].reshape(H, d_v, D)          # per-head W_O slabs
    w1, w2 = params["w1"], params["w2"]

    in_specs = [
        pl.BlockSpec((1, S, D), lambda b: (b, 0, 0)),           # x
        pl.BlockSpec((1, S, S), lambda b: (b, 0, 0)),           # mask
        pl.BlockSpec((1, H, S, S), lambda b: (b, 0, 0, 0)),     # bias
        # weights: constant index_maps -> fetched once, VMEM-resident
        pl.BlockSpec((D, H * 3 * d_k), lambda b: (0, 0)),       # W_qkv
        pl.BlockSpec((H, d_v, D), lambda b: (0, 0, 0)),         # W_O
        pl.BlockSpec((D, d_ff), lambda b: (0, 0)),              # W_1
        pl.BlockSpec((d_ff, D), lambda b: (0, 0)),              # W_2
    ]
    out_spec_x = pl.BlockSpec((1, S, D), lambda b: (b, 0, 0))
    out_shape_x = jax.ShapeDtypeStruct((B, S, D), jnp.float32)

    if return_attn:
        out_shape = (out_shape_x,
                     jax.ShapeDtypeStruct((B, H, S, S), jnp.float32))
        out_specs = (out_spec_x,
                     pl.BlockSpec((1, H, S, S), lambda b: (b, 0, 0, 0)))
    else:
        out_shape = out_shape_x
        out_specs = out_spec_x

    result = pl.pallas_call(
        _encoder_layer_kernel,
        grid=(B,),
        in_specs=in_specs,
        out_specs=out_specs,
        out_shape=out_shape,
        compiler_params=pltpu.CompilerParams(
            dimension_semantics=("parallel",),       # v7x: shard batch over 2 TCs
            vmem_limit_bytes=64 * 1024 * 1024),
    )(x, attn_mask, md_bias, w_qkv, wo3, w1, w2)

    if return_attn:
        return result
    return result, None


# -------- pure-JAX reference (mirrors the PyTorch forward) --------
def encoder_layer_ref(x, attn_mask, md_bias, params):
    B, S, D = x.shape
    Q = (x @ params["wq"]).reshape(B, S, N_HEADS, D_K).transpose(0, 2, 1, 3)
    K = (x @ params["wk"]).reshape(B, S, N_HEADS, D_K).transpose(0, 2, 1, 3)
    V = (x @ params["wv"]).reshape(B, S, N_HEADS, D_V).transpose(0, 2, 1, 3)
    scores = jnp.einsum("bhqd,bhkd->bhqk", Q, K) / math.sqrt(D_K) + md_bias
    scores = jnp.where(attn_mask[:, None, :, :] > 0.5, -1e9, scores)
    attn = jax.nn.softmax(scores, axis=-1)
    ctx = jnp.einsum("bhqk,bhkd->bhqd", attn, V)
    ctx = ctx.transpose(0, 2, 1, 3).reshape(B, S, N_HEADS * D_V)
    out = ctx @ params["wo"]
    h1 = _layer_norm(out + x)
    ff = jnp.maximum(h1 @ params["w1"], 0.0) @ params["w2"]
    return _layer_norm(ff + h1), attn


if __name__ == "__main__":
    B, S = 2, 8
    key = jax.random.PRNGKey(0)
    ks = jax.random.split(key, 10)

    x = jax.random.normal(ks[0], (B, S, D_MODEL), dtype=jnp.float32)
    md_bias = 0.1 * jax.random.normal(ks[1], (B, N_HEADS, S, S), dtype=jnp.float32)
    # boolean mask (True == masked) passed as float32 (1.0 == masked)
    attn_mask = (jax.random.uniform(ks[2], (B, S, S)) < 0.2).astype(jnp.float32)

    def init_w(k, shape):
        fan_in = shape[0]
        return (jax.random.normal(k, shape, dtype=jnp.float32)
                / math.sqrt(fan_in))

    params = {
        "wq": init_w(ks[3], (D_MODEL, N_HEADS * D_K)),
        "wk": init_w(ks[4], (D_MODEL, N_HEADS * D_K)),
        "wv": init_w(ks[5], (D_MODEL, N_HEADS * D_V)),
        "wo": init_w(ks[6], (N_HEADS * D_V, D_MODEL)),
        "w1": init_w(ks[7], (D_MODEL, D_FF)),
        "w2": init_w(ks[8], (D_FF, D_MODEL)),
    }

    enc_out, attn = encoder_layer(x, attn_mask, md_bias, params)
    jax.block_until_ready((enc_out, attn))

    ref_out, ref_attn = encoder_layer_ref(x, attn_mask, md_bias, params)
    assert jnp.allclose(enc_out, ref_out, atol=1e-4, rtol=1e-4)
    assert jnp.allclose(attn, ref_attn, atol=1e-5, rtol=1e-4)

    # also exercise the cheaper attn-free path once (no masked narrow stores)
    enc_only, _ = encoder_layer(x, attn_mask, md_bias, params, return_attn=False)
    jax.block_until_ready(enc_only)
    assert jnp.allclose(enc_only, ref_out, atol=1e-4, rtol=1e-4)

    print("KERNEL_OK")
</pallas_src>

<mosaic_0001>
module attributes {stable_mosaic.version = 11 : i64} {
  func.func @_encoder_layer_kernel(%arg0: i32, %arg1: memref<1x8x128xf32, #tpu.memory_space<vmem>>, %arg2: memref<1x8x8xf32, #tpu.memory_space<vmem>>, %arg3: memref<1x4x8x8xf32, #tpu.memory_space<vmem>>, %arg4: memref<128x384xf32, #tpu.memory_space<vmem>>, %arg5: memref<4x32x128xf32, #tpu.memory_space<vmem>>, %arg6: memref<128x256xf32, #tpu.memory_space<vmem>>, %arg7: memref<256x128xf32, #tpu.memory_space<vmem>>, %arg8: memref<1x8x128xf32, #tpu.memory_space<vmem>>, %arg9: memref<1x4x8x8xf32, #tpu.memory_space<vmem>>) attributes {dimension_semantics = [#tpu.dimension_semantics<parallel>], iteration_bounds = array<i64: 2>, scalar_prefetch = 0 : i64, scratch_operands = 0 : i64, tpu.core_type = #tpu.core_type<tc>, window_params = [{transform_indices = @transform_0, window_bounds = array<i64: 1, 8, 128>}, {transform_indices = @transform_1, window_bounds = array<i64: 1, 8, 8>}, {transform_indices = @transform_2, window_bounds = array<i64: 1, 4, 8, 8>}, {pipeline_mode = #tpu.pipeline_mode<synchronous>, transform_indices = @transform_3, window_bounds = array<i64: 128, 384>}, {pipeline_mode = #tpu.pipeline_mode<synchronous>, transform_indices = @transform_4, window_bounds = array<i64: 4, 32, 128>}, {pipeline_mode = #tpu.pipeline_mode<synchronous>, transform_indices = @transform_5, window_bounds = array<i64: 128, 256>}, {pipeline_mode = #tpu.pipeline_mode<synchronous>, transform_indices = @transform_6, window_bounds = array<i64: 256, 128>}, {transform_indices = @transform_7, window_bounds = array<i64: 1, 8, 128>}, {transform_indices = @transform_8, window_bounds = array<i64: 1, 4, 8, 8>}]} {
    %c0 = arith.constant 0 : index
    %c0_0 = arith.constant 0 : index
    %c0_1 = arith.constant 0 : index
    %0 = vector.load %arg1[%c0, %c0_0, %c0_1] : memref<1x8x128xf32, #tpu.memory_space<vmem>>, vector<1x8x128xf32>
    %1 = vector.shape_cast %0 : vector<1x8x128xf32> to vector<8x128xf32>
    %c0_2 = arith.constant 0 : index
    %c0_3 = arith.constant 0 : index
    %2 = vector.load %arg4[%c0_2, %c0_3] : memref<128x384xf32, #tpu.memory_space<vmem>>, vector<128x384xf32>
    %cst = arith.constant dense<0.000000e+00> : vector<8x384xf32>
    %3 = tpu.matmul %1, %2, %cst {dimension_numbers = #tpu.dot_dimension_numbers<[1], [0], [0], [1], [0, 0, 1, 1], [], []>} : vector<8x128xf32>, vector<128x384xf32>, vector<8x384xf32> -> vector<8x384xf32>
    %4 = vector.extract_strided_slice %3 {offsets = [0, 0], sizes = [8, 96], strides = [1, 1]} : vector<8x384xf32> to vector<8x96xf32>
    %5 = vector.extract_strided_slice %3 {offsets = [0, 96], sizes = [8, 96], strides = [1, 1]} : vector<8x384xf32> to vector<8x96xf32>
    %6 = vector.extract_strided_slice %3 {offsets = [0, 192], sizes = [8, 96], strides = [1, 1]} : vector<8x384xf32> to vector<8x96xf32>
    %7 = vector.extract_strided_slice %3 {offsets = [0, 288], sizes = [8, 96], strides = [1, 1]} : vector<8x384xf32> to vector<8x96xf32>
    %8 = vector.shape_cast %4 : vector<8x96xf32> to vector<1x8x96xf32>
    %9 = vector.shape_cast %5 : vector<8x96xf32> to vector<1x8x96xf32>
    %10 = vector.shape_cast %6 : vector<8x96xf32> to vector<1x8x96xf32>
    %11 = vector.shape_cast %7 : vector<8x96xf32> to vector<1x8x96xf32>
    %12 = tpu.concatenate %8, %9, %10, %11 in 0 : vector<1x8x96xf32>, vector<1x8x96xf32>, vector<1x8x96xf32>, vector<1x8x96xf32> -> vector<4x8x96xf32>
    %13 = vector.extract_strided_slice %12 {offsets = [0, 0, 0], sizes = [4, 8, 32], strides = [1, 1, 1]} : vector<4x8x96xf32> to vector<4x8x32xf32>
    %14 = vector.extract_strided_slice %12 {offsets = [0, 0, 32], sizes = [4, 8, 32], strides = [1, 1, 1]} : vector<4x8x96xf32> to vector<4x8x32xf32>
    %15 = vector.extract_strided_slice %12 {offsets = [0, 0, 64], sizes = [4, 8, 32], strides = [1, 1, 1]} : vector<4x8x96xf32> to vector<4x8x32xf32>
    %c0_4 = arith.constant 0 : index
    %c0_5 = arith.constant 0 : index
    %c0_6 = arith.constant 0 : index
    %16 = vector.load %arg2[%c0_4, %c0_5, %c0_6] : memref<1x8x8xf32, #tpu.memory_space<vmem>>, vector<1x8x8xf32>
    %17 = vector.shape_cast %16 : vector<1x8x8xf32> to vector<8x8xf32>
    %cst_7 = arith.constant 5.000000e-01 : f32
    %18 = vector.broadcast %cst_7 : f32 to vector<8x8xf32>
    %19 = arith.cmpf ogt, %17, %18 : vector<8x8xf32>
    %cst_8 = arith.constant -1.000000e+09 : f32
    %cst_9 = arith.constant 0.000000e+00 : f32
    %20 = vector.broadcast %cst_8 : f32 to vector<8x8xf32>
    %21 = vector.broadcast %cst_9 : f32 to vector<8x8xf32>
    %22 = arith.select %19, %20, %21 : vector<8x8xi1>, vector<8x8xf32>
    %c0_10 = arith.constant 0 : index
    %c0_11 = arith.constant 0 : index
    %c0_12 = arith.constant 0 : index
    %c0_13 = arith.constant 0 : index
    %23 = vector.load %arg3[%c0_10, %c0_11, %c0_12, %c0_13] : memref<1x4x8x8xf32, #tpu.memory_space<vmem>>, vector<1x4x8x8xf32>
    %24 = vector.shape_cast %23 : vector<1x4x8x8xf32> to vector<4x8x8xf32>
    %25 = vector.shape_cast %22 : vector<8x8xf32> to vector<1x8x8xf32>
    %26 = vector.broadcast %25 : vector<1x8x8xf32> to vector<4x8x8xf32>
    %27 = arith.addf %24, %26 : vector<4x8x8xf32>
    %cst_14 = arith.constant dense<0.000000e+00> : vector<4x8x8xf32>
    %28 = tpu.matmul %13, %14, %cst_14 {dimension_numbers = #tpu.dot_dimension_numbers<[2], [2], [1], [1], [0, 0, 0, 1, 1, 1], [0], [0]>} : vector<4x8x32xf32>, vector<4x8x32xf32>, vector<4x8x8xf32> -> vector<4x8x8xf32>
    %cst_15 = arith.constant 0.176776692 : f32
    %29 = vector.broadcast %cst_15 : f32 to vector<4x8x8xf32>
    %30 = arith.mulf %28, %29 : vector<4x8x8xf32>
    %31 = arith.addf %30, %27 : vector<4x8x8xf32>
    %cst_16 = arith.constant dense<0xFF800000> : vector<4x8xf32>
    %32 = vector.multi_reduction <maximumf>, %31, %cst_16 [2] : vector<4x8x8xf32> to vector<4x8xf32>
    %33 = vector.shape_cast %32 : vector<4x8xf32> to vector<4x8x1xf32>
    %34 = vector.broadcast %33 : vector<4x8x1xf32> to vector<4x8x8xf32>
    %35 = arith.subf %31, %34 : vector<4x8x8xf32>
    %36 = math.exp %35 : vector<4x8x8xf32>
    %cst_17 = arith.constant dense<0.000000e+00> : vector<4x8xf32>
    %37 = vector.multi_reduction <add>, %36, %cst_17 [2] : vector<4x8x8xf32> to vector<4x8xf32>
    %38 = vector.shape_cast %37 : vector<4x8xf32> to vector<4x8x1xf32>
    %39 = tpu.reciprocal %38 : vector<4x8x1xf32> -> vector<4x8x1xf32>
    %40 = vector.broadcast %39 : vector<4x8x1xf32> to vector<4x8x8xf32>
    %41 = arith.mulf %36, %40 : vector<4x8x8xf32>
    %c0_18 = arith.constant 0 : index
    %c0_19 = arith.constant 0 : index
    %c0_20 = arith.constant 0 : index
    %c0_21 = arith.constant 0 : index
    %42 = vector.load %arg9[%c0_18, %c0_19, %c0_20, %c0_21] : memref<1x4x8x8xf32, #tpu.memory_space<vmem>>, vector<1x4x8x8xf32>
    %43 = vector.shape_cast %42 : vector<1x4x8x8xf32> to vector<4x8x8xf32>
    %44 = vector.shape_cast %41 : vector<4x8x8xf32> to vector<1x4x8x8xf32>
    tpu.vector_store %arg9[%c0_18, %c0_19, %c0_20, %c0_21], %44 {strides = array<i32>} : memref<1x4x8x8xf32, #tpu.memory_space<vmem>>, vector<1x4x8x8xf32>,
    %cst_22 = arith.constant dense<0.000000e+00> : vector<4x8x32xf32>
    %45 = tpu.matmul %41, %15, %cst_22 {dimension_numbers = #tpu.dot_dimension_numbers<[2], [1], [1], [2], [0, 0, 0, 1, 1, 2], [0], [0]>} : vector<4x8x8xf32>, vector<4x8x32xf32>, vector<4x8x32xf32> -> vector<4x8x32xf32>
    %c0_23 = arith.constant 0 : index
    %c0_24 = arith.constant 0 : index
    %c0_25 = arith.constant 0 : index
    %46 = vector.load %arg5[%c0_23, %c0_24, %c0_25] : memref<4x32x128xf32, #tpu.memory_space<vmem>>, vector<4x32x128xf32>
    %cst_26 = arith.constant dense<0.000000e+00> : vector<4x8x128xf32>
    %47 = tpu.matmul %45, %46, %cst_26 {dimension_numbers = #tpu.dot_dimension_numbers<[2], [1], [1], [2], [0, 0, 0, 1, 1, 2], [0], [0]>} : vector<4x8x32xf32>, vector<4x32x128xf32>, vector<4x8x128xf32> -> vector<4x8x128xf32>
    %cst_27 = arith.constant dense<0.000000e+00> : vector<8x128xf32>
    %48 = vector.multi_reduction <add>, %47, %cst_27 [0] : vector<4x8x128xf32> to vector<8x128xf32>
    %49 = arith.addf %48, %1 : vector<8x128xf32>
    %cst_28 = arith.constant dense<0.000000e+00> : vector<8xf32>
    %50 = vector.multi_reduction <add>, %49, %cst_28 [1] : vector<8x128xf32> to vector<8xf32>
    %51 = vector.shape_cast %50 : vector<8xf32> to vector<8x1xf32>
    %cst_29 = arith.constant 1.280000e+02 : f32
    %52 = vector.broadcast %cst_29 : f32 to vector<8x1xf32>
    %53 = arith.divf %51, %52 : vector<8x1xf32>
    %54 = vector.broadcast %53 : vector<8x1xf32> to vector<8x128xf32>
    %55 = arith.subf %49, %54 : vector<8x128xf32>
    %56 = arith.mulf %55, %55 : vector<8x128xf32>
    %cst_30 = arith.constant dense<0.000000e+00> : vector<8xf32>
    %57 = vector.multi_reduction <add>, %56, %cst_30 [1] : vector<8x128xf32> to vector<8xf32>
    %58 = vector.shape_cast %57 : vector<8xf32> to vector<8x1xf32>
    %cst_31 = arith.constant 1.280000e+02 : f32
    %59 = vector.broadcast %cst_31 : f32 to vector<8x1xf32>
    %60 = arith.divf %58, %59 : vector<8x1xf32>
    %61 = vector.broadcast %53 : vector<8x1xf32> to vector<8x128xf32>
    %62 = arith.subf %49, %61 : vector<8x128xf32>
    %cst_32 = arith.constant 9.99999974E-6 : f32
    %63 = vector.broadcast %cst_32 : f32 to vector<8x1xf32>
    %64 = arith.addf %60, %63 : vector<8x1xf32>
    %65 = math.rsqrt %64 : vector<8x1xf32>
    %66 = vector.broadcast %65 : vector<8x1xf32> to vector<8x128xf32>
    %67 = arith.mulf %62, %66 : vector<8x128xf32>
    %c0_33 = arith.constant 0 : index
    %c0_34 = arith.constant 0 : index
    %68 = vector.load %arg6[%c0_33, %c0_34] : memref<128x256xf32, #tpu.memory_space<vmem>>, vector<128x256xf32>
    %cst_35 = arith.constant dense<0.000000e+00> : vector<8x256xf32>
    %69 = tpu.matmul %67, %68, %cst_35 {dimension_numbers = #tpu.dot_dimension_numbers<[1], [0], [0], [1], [0, 0, 1, 1], [], []>} : vector<8x128xf32>, vector<128x256xf32>, vector<8x256xf32> -> vector<8x256xf32>
    %cst_36 = arith.constant 0.000000e+00 : f32
    %70 = vector.broadcast %cst_36 : f32 to vector<8x256xf32>
    %71 = arith.maximumf %69, %70 : vector<8x256xf32>
    %c0_37 = arith.constant 0 : index
    %c0_38 = arith.constant 0 : index
    %72 = vector.load %arg7[%c0_37, %c0_38] : memref<256x128xf32, #tpu.memory_space<vmem>>, vector<256x128xf32>
    %cst_39 = arith.constant dense<0.000000e+00> : vector<8x128xf32>
    %73 = tpu.matmul %71, %72, %cst_39 {dimension_numbers = #tpu.dot_dimension_numbers<[1], [0], [0], [1], [0, 0, 1, 1], [], []>} : vector<8x256xf32>, vector<256x128xf32>, vector<8x128xf32> -> vector<8x128xf32>
    %74 = arith.addf %73, %67 : vector<8x128xf32>
    %cst_40 = arith.constant dense<0.000000e+00> : vector<8xf32>
    %75 = vector.multi_reduction <add>, %74, %cst_40 [1] : vector<8x128xf32> to vector<8xf32>
    %76 = vector.shape_cast %75 : vector<8xf32> to vector<8x1xf32>
    %cst_41 = arith.constant 1.280000e+02 : f32
    %77 = vector.broadcast %cst_41 : f32 to vector<8x1xf32>
    %78 = arith.divf %76, %77 : vector<8x1xf32>
    %79 = vector.broadcast %78 : vector<8x1xf32> to vector<8x128xf32>
    %80 = arith.subf %74, %79 : vector<8x128xf32>
    %81 = arith.mulf %80, %80 : vector<8x128xf32>
    %cst_42 = arith.constant dense<0.000000e+00> : vector<8xf32>
    %82 = vector.multi_reduction <add>, %81, %cst_42 [1] : vector<8x128xf32> to vector<8xf32>
    %83 = vector.shape_cast %82 : vector<8xf32> to vector<8x1xf32>
    %cst_43 = arith.constant 1.280000e+02 : f32
    %84 = vector.broadcast %cst_43 : f32 to vector<8x1xf32>
    %85 = arith.divf %83, %84 : vector<8x1xf32>
    %86 = vector.broadcast %78 : vector<8x1xf32> to vector<8x128xf32>
    %87 = arith.subf %74, %86 : vector<8x128xf32>
    %cst_44 = arith.constant 9.99999974E-6 : f32
    %88 = vector.broadcast %cst_44 : f32 to vector<8x1xf32>
    %89 = arith.addf %85, %88 : vector<8x1xf32>
    %90 = math.rsqrt %89 : vector<8x1xf32>
    %91 = vector.broadcast %90 : vector<8x1xf32> to vector<8x128xf32>
    %92 = arith.mulf %87, %91 : vector<8x128xf32>
    %c0_45 = arith.constant 0 : index
    %c0_46 = arith.constant 0 : index
    %c0_47 = arith.constant 0 : index
    %93 = vector.load %arg8[%c0_45, %c0_46, %c0_47] : memref<1x8x128xf32, #tpu.memory_space<vmem>>, vector<1x8x128xf32>
    %94 = vector.shape_cast %93 : vector<1x8x128xf32> to vector<8x128xf32>
    %95 = vector.shape_cast %92 : vector<8x128xf32> to vector<1x8x128xf32>
    tpu.vector_store %arg8[%c0_45, %c0_46, %c0_47], %95 {strides = array<i32>} : memref<1x8x128xf32, #tpu.memory_space<vmem>>, vector<1x8x128xf32>,
    return
  }
  func.func @transform_0(%arg0: i32) -> (i32, i32, i32) {
    %c0_i32 = arith.constant 0 : i32
    %c0_i32_0 = arith.constant 0 : i32
    %c0_i32_1 = arith.constant 0 : i32
    return %arg0, %c0_i32, %c0_i32_0 : i32, i32, i32
  }
  func.func @transform_1(%arg0: i32) -> (i32, i32, i32) {
    %c0_i32 = arith.constant 0 : i32
    %c0_i32_0 = arith.constant 0 : i32
    %c0_i32_1 = arith.constant 0 : i32
    return %arg0, %c0_i32, %c0_i32_0 : i32, i32, i32
  }
  func.func @transform_2(%arg0: i32) -> (i32, i32, i32, i32) {
    %c0_i32 = arith.constant 0 : i32
    %c0_i32_0 = arith.constant 0 : i32
    %c0_i32_1 = arith.constant 0 : i32
    %c0_i32_2 = arith.constant 0 : i32
    return %arg0, %c0_i32, %c0_i32_0, %c0_i32_1 : i32, i32, i32, i32
  }
  func.func @transform_3(%arg0: i32) -> (i32, i32) {
    %c0_i32 = arith.constant 0 : i32
    %c0_i32_0 = arith.constant 0 : i32
    %c0_i32_1 = arith.constant 0 : i32
    return %c0_i32, %c0_i32_0 : i32, i32
  }
  func.func @transform_4(%arg0: i32) -> (i32, i32, i32) {
    %c0_i32 = arith.constant 0 : i32
    %c0_i32_0 = arith.constant 0 : i32
    %c0_i32_1 = arith.constant 0 : i32
    %c0_i32_2 = arith.constant 0 : i32
    return %c0_i32, %c0_i32_0, %c0_i32_1 : i32, i32, i32
  }
  func.func @transform_5(%arg0: i32) -> (i32, i32) {
    %c0_i32 = arith.constant 0 : i32
    %c0_i32_0 = arith.constant 0 : i32
    %c0_i32_1 = arith.constant 0 : i32
    return %c0_i32, %c0_i32_0 : i32, i32
  }
  func.func @transform_6(%arg0: i32) -> (i32, i32) {
    %c0_i32 = arith.constant 0 : i32
    %c0_i32_0 = arith.constant 0 : i32
    %c0_i32_1 = arith.constant 0 : i32
    return %c0_i32, %c0_i32_0 : i32, i32
  }
  func.func @transform_7(%arg0: i32) -> (i32, i32, i32) {
    %c0_i32 = arith.constant 0 : i32
    %c0_i32_0 = arith.constant 0 : i32
    %c0_i32_1 = arith.constant 0 : i32
    return %arg0, %c0_i32, %c0_i32_0 : i32, i32, i32
  }
  func.func @transform_8(%arg0: i32) -> (i32, i32, i32, i32) {
    %c0_i32 = arith.constant 0 : i32
    %c0_i32_0 = arith.constant 0 : i32
    %c0_i32_1 = arith.constant 0 : i32
    %c0_i32_2 = arith.constant 0 : i32
    return %arg0, %c0_i32, %c0_i32_0, %c0_i32_1 : i32, i32, i32, i32
  }
}

</mosaic_0001>

<bundles_post_ra>
// kernel: tpu_custom_call.1
= control target key start
LH: loop header
LB: loop body
LE: loop exit
PB: predicated region body
PF: predicated region fallthrough
CT: control target
= control target key end

     0   :  { %s3318_s0 = inlined_call_operand.hbm [shape: f32[2,8,128], index: 0, kind: input, shape index: {}]   ;;  %s3319_s1 = inlined_call_operand.hbm [shape: f32[2,8,8], index: 1, kind: input, shape index: {}]   ;;  %s3320_s2 = inlined_call_operand.hbm [shape: f32[2,4,8,8], index: 2, kind: input, shape index: {}]   ;;  %s3321_s3 = inlined_call_operand.hbm [shape: f32[128,384], index: 3, kind: input, shape index: {}]   ;;  %s3322_s4 = inlined_call_operand.hbm [shape: f32[4,32,128], index: 4, kind: input, shape index: {}]   ;;  %s3323_s5 = inlined_call_operand.hbm [shape: f32[128,256], index: 5, kind: input, shape index: {}]   ;;  %s3324_s6 = inlined_call_operand.hbm [shape: f32[256,128], index: 6, kind: input, shape index: {}]   ;;  %s3325_s7 = inlined_call_operand.hbm [shape: f32[2,8,128], index: 7, kind: output, shape index: {0}]   ;;  %s3326_s8 = inlined_call_operand.hbm [shape: f32[2,4,8,8], index: 8, kind: output, shape index: {1}]  }
   0x1   :  { %3342 = sst [smem:[#allocation27_spill]] %s3319_s1 }
   0x2   :  { %3343 = sst [smem:[#allocation28_spill]] %s3321_s3 }
   0x3   :  { %3344 = sst [smem:[#allocation29_spill]] %s3323_s5 }
   0x4   :  { %14 = vsyncpa [#allocation3], 0 }
   0x5   :  { %16 = vsyncpa [#allocation3 + $0x1], 0 }
   0x6   :  { %17 = vsyncpa [#allocation6], 0 }
   0x7   :  { %19 = vsyncpa [#allocation6 + $0x1], 0 }
   0x8   :  { %20 = vsyncpa [#allocation9], 0 }
   0x9   :  { %21 = vsyncpa [#allocation12], 0 }
   0xa   :  { %22 = vsyncpa [#allocation4], 0 }
   0xb   :  { %24 = vsyncpa [#allocation4 + $0x1], 0 }
   0xc   :  { %25 = vsyncpa [#allocation16], 0 }
   0xd   :  { %27 = vsyncpa [#allocation16 + $0x1], 0  ;;  %s2862_s27 = smov 0   ;;  %s2864_s28 = smov 0  }
   0xe   :  { %s2866_s29 = smov 0   ;;  %s2868_s30 = smov 0  }
   0xf LB: > { %3345 = sst [smem:[#allocation23_spill]] %s2789_s29  ;;  %s2795_s9 = smov [#allocation8]   ;;  %s2793_s30 = sphi %s2868_s30, %s3377_s30   ;;  %s2789_s29 = sphi %s2866_s29, %s3379_s29   ;;  %s2785_s28 = sphi %s2864_s28, %s3381_s28   ;;  %s2781_s27 = sphi %s2862_s27, %s3380_s27  }
  0x10   : > { %s264_s10 = sshll.u32 %s2795_s9, 4  ;;  %s2883_s11 = sadd.s32 4294967295, %s2793_s30   ;;  %s265_s10 = int_to_ptr.vmem [resolvable:$true] %s264_s10 }
  0x11   : > { %p2109_p0 = scmp.ge.s32.totalorder %s2793_s30, 1  ;;  %p3330_p1 = scmp.eq.s32.totalorder %s2883_s11, 0 }
  0x12   : > { %p252_p2 = scmp.lt.s32.totalorder %s2793_s30, 3  ;;  %s2796_s13 = smov [#allocation11]  }
  0x13   : > { %s290_s14 = sshll.u32 %s2796_s13, 4  ;;  %s2510_s16 = scalar_lea.vmem %s265_s10, 6144  ;;  %s291_s14 = int_to_ptr.vmem [resolvable:$true] %s290_s14 }
  0x14   : > { %p2888_p3 = pnand %p2109_p0, %p252_p2  ;;  %p2511_p8 = scmp.ne.s32.totalorder %s265_s10, %s2510_s16 }
  0x15   : > { %p2518_p11 = scmp.lt.s32.totalorder %s265_s10, %s265_s10  ;;  %p2519_p12 = scmp.lt.s32.totalorder %s2510_s16, %s2510_s16 }
  0x16   : > { %s3346_s12 = scalar_select %p2888_p3, 1, 0 }
  0x17   : > { %p2390_p5 = pneg %p2888_p3  ;;  %p2520_p13 = por %p2519_p12, %p2518_p11 }
  0x19   : > { %p2897_p6 = pnand %p2390_p5, %p3330_p1 }
  0x1b   : > { %s3347_s15 = scalar_select %p2897_p6, 1, 0 }
  0x1c   : > { %p3331_p7 = pneg %p2897_p6 }
  0x1e   : > { %p2513_p9 = pnand %p2511_p8, %p3331_p7 }
  0x20   : > { %p2514_p10 = pneg %p2513_p9 }
  0x22   : > { %p2521_p0 = pnand %p2520_p13, %p2514_p10 }
  0x24   : > { %2524 = shalt.err (!%p2521_p0)
}
  0x25   : > { %s2797_s17 = smov 384   ;;  %s2798_s18 = smov 24  }
  0x26   : > { %s3348_s3 = sld [smem:[#allocation28_spill]]  ;;  %s2536_s21 = scalar_lea.vmem %s291_s14, 4096 }
  0x27   : > { %p2537_p2 = scmp.ne.s32.totalorder %s291_s14, %s2536_s21  ;;  %p2544_p9 = scmp.lt.s32.totalorder %s291_s14, %s291_s14 }
  0x28   : > { %p2545_p4 = scmp.lt.s32.totalorder %s2536_s21, %s2536_s21 }
  0x29   : > { %p2539_p5 = pnand %p2537_p2, %p3331_p7 }
  0x2a   : > { %p2546_p11 = por %p2545_p4, %p2544_p9 }
  0x2b   : > { %p2540_p8 = pneg %p2539_p5 }
  0x2c   : > { %2393 = dma.hbm_to_vmem [thread:$0]  (!%p2897_p6), %s3348_s3, 6144, %s265_s10, [#allocation9], %s2797_s17, %s2797_s17, %s2798_s18  }
  0x2d   : > { %p2547_p10 = pnand %p2546_p11, %p2540_p8 }
  0x2f   : > { %2550 = shalt.err (!%p2547_p10)
}
  0x30   : > { %s2799_s22 = smov 256   ;;  %s2800_s23 = smov 16  }
  0x31   : > { %s3349_s5 = sld [smem:[#allocation29_spill]]  ;;  %s2108_s26 = sadd.s32 4294967294, %s2793_s30  }
  0x32   : > { %s2921_s9 = sadd.s32 1, %s2793_s30   ;;  %s40_s13 = sadd.s32 1, %s2789_s29 }
  0x33   : > { %3350 = sst [smem:[#allocation24_spill]] %s2921_s9  ;;  %s37_s10 = ssub.s32 %s2793_s30, %s2921_s9 }
  0x34   : > { %p38_p4 = scmp.eq.s32.totalorder %s37_s10, 0  ;;  %p47_p12 = scmp.ne.s32.totalorder %s2789_s29, %s2785_s28 }
  0x35   : > { %p48_p13 = scmp.eq.s32.totalorder %s2793_s30, 0  ;;  %p53_p0 = scmp.ne.s32.totalorder %s2785_s28, %s2781_s27 }
  0x36   : > { %s2932_s16 = scalar_select %p38_p4, %s2789_s29, %s40_s13  }
  0x37   : > { %2399 = dma.hbm_to_vmem [thread:$0]  (!%p2897_p6), %s3349_s5, 4096, %s291_s14, [#allocation12], %s2799_s22, %s2799_s22, %s2800_s23  }
  0x38   : > { %3351 = sst [smem:[#allocation25_spill]] %s2932_s16  ;;  %p49_p2 = por %p48_p13, %p47_p12 }
  0x39   : > { %p2936_p5 = por %p3330_p1, %p53_p0  ;;  %p213_p8 = scmp.eq.s32.totalorder %s2883_s11, 1 }
  0x3a   : > { %p219_p9 = scmp.eq.s32.totalorder %s2108_s26, 1  ;;  %p2424_p11 = scmp.lt.s32.totalorder %s2793_s30, 2 }
  0x3b   : > { %s3352_s17 = scalar_select %p2936_p5, 1, 0 }
  0x3c   : > { %s2943_s14 = sand.u32 1, %s2789_s29   ;;  %p2945_p10 = por %p213_p8, %p47_p12 }
  0x3d   : > { %p2949_p4 = por %p219_p9, %p53_p0  ;;  %s3328_s20 = sshll.u32 %s2943_s14, 3 }
  0x3e   : > { %s3353_s18 = scalar_select %p2945_p10, 1, 0 }
  0x3f   : > { %s3354_s19 = scalar_select %p2949_p4, 1, 0 }
  0x40   : > { %s3329_s21 = sshll.u32 %s2793_s30, 7  ;;  %p2955_p13 = pnand %p2424_p11, %p49_p2 }
  0x41   : > { %3355 = sst [smem:[#allocation26_spill]] %s3354_s19  ;;  %s335_s23 = sand.u32 1, %s2793_s30  }
  0x42   : > { %s3357_s1 = sld [smem:[#allocation27_spill]]  ;;  %s339_s10 = scalar_lea.vmem [#allocation5], %s3328_s20 }
  0x43   : > { %s346_s13 = sshll.u32 %s339_s10, 4  ;;  %s2970_s5 = scalar_lea.sflag [#allocation6], %s335_s23  ;;  %s347_s13 = int_to_ptr.vmem [resolvable:$true] %s346_s13 }
  0x44   : > { %p2976_p0 = pneg %p2955_p13 }
  0x48   : > { %s2965_s26 = scalar_lea.hbm %s3357_s1, %s3329_s21  ;;  %s2556_s20 = scalar_lea.hbm %s3357_s1, 256 }
  0x49   : > { %s2551_s16 = scalar_lea.hbm %s2965_s26, 128  ;;  %p2557_p9 = scmp.lt.s32.totalorder %s2965_s26, %s3357_s1 }
  0x4a   : > { %p2552_p12 = scmp.ne.s32.totalorder %s2965_s26, %s2551_s16  ;;  %p2558_p11 = scmp.lt.s32.totalorder %s2556_s20, %s2551_s16 }
  0x4c   : > { %p2554_p2 = pnand %p2976_p0, %p2552_p12  ;;  %p2559_p1 = por %p2558_p11, %p2557_p9 }
  0x4e   : > { %p2555_p8 = pneg %p2554_p2 }
  0x50   : > { %p2560_p7 = pnand %p2559_p1, %p2555_p8 }
  0x52   : > { %2563 = shalt.err (!%p2560_p7)
}
  0x53   : > { %s2564_s23 = scalar_lea.vmem %s347_s13, 128  ;;  %s2801_s3 = smov [#allocation5]  }
  0x54   : > { %p2565_p4 = scmp.ne.s32.totalorder %s347_s13, %s2564_s23  ;;  %s2569_s9 = sshll.u32 %s2801_s3, 4  ;;  %s2570_s9 = int_to_ptr.vmem [resolvable:$false] %s2569_s9 }
  0x55   : > { %s2571_s19 = scalar_lea.vmem %s2570_s9, 256  ;;  %p2572_p12 = scmp.lt.s32.totalorder %s347_s13, %s2570_s9 }
  0x56   : > { %p2567_p10 = pnand %p2565_p4, %p2976_p0  ;;  %p2573_p2 = scmp.lt.s32.totalorder %s2571_s19, %s2564_s23 }
  0x58   : > { %p2568_p5 = pneg %p2567_p10  ;;  %p2574_p3 = por %p2573_p2, %p2572_p12 }
  0x5a   : > { %p2575_p6 = pnand %p2574_p3, %p2568_p5 }
  0x5c   : > { %2578 = shalt.err (!%p2575_p6)
}
  0x5d   : > { %2409 = dma.hbm_to_vmem [thread:$0]  (!%p2955_p13), %s2965_s26, 128, %s347_s13, %s2970_s5  }
  0x5e   : > { %s3359_s16 = sshll.u32 %s2943_s14, 5  ;;  %s2802_s3 = smov [#allocation10]  }
  0x5f   : > { %s357_s20 = scalar_lea.vmem [#allocation7], %s3359_s16  ;;  %s277_s24 = sshll.u32 %s2802_s3, 4  ;;  %s278_s24 = int_to_ptr.vmem [resolvable:$true] %s277_s24 }
  0x60   : > { %s364_s21 = sshll.u32 %s357_s20, 4  ;;  %s2590_s9 = scalar_lea.vmem %s278_s24, 2048  ;;  %s2997_s21 = int_to_ptr.vmem [resolvable:$true] %s364_s21 }
  0x61   : > { %p2591_p1 = scmp.ne.s32.totalorder %s278_s24, %s2590_s9  ;;  %p3360_p7 = scmp.ne.s32.totalorder %s3347_s15, 0 }
  0x62   : > { %p2598_p10 = scmp.lt.s32.totalorder %s278_s24, %s278_s24  ;;  %p2599_p4 = scmp.lt.s32.totalorder %s2590_s9, %s2590_s9 }
  0x63   : > { %p3361_p3 = pneg %p3360_p7 }
  0x64   : > { %p2600_p8 = por %p2599_p4, %p2598_p10 }
  0x65   : > { %p2593_p6 = pnand %p2591_p1, %p3361_p3 }
  0x67   : > { %p2594_p5 = pneg %p2593_p6 }
  0x69   : > { %p2601_p9 = pnand %p2600_p8, %p2594_p5 }
  0x6b   : > { %2604 = shalt.err (!%p2601_p9)
}
  0x6c   : > { %s3340_s19 = smov 128   ;;  %s3341_s26 = smov 8  }
  0x6d   : > { %2396 = dma.hbm_to_vmem [thread:$0]  (!%p3360_p7), %s3322_s4, 2048, %s278_s24, [#allocation9], %s3340_s19, %s3340_s19, %s3341_s26  }
  0x6e   : > { %s2805_s10 = smov [#allocation13]   ;;  %p3362_p12 = pmov %p3361_p3 }
  0x6f   : > { %s303_s23 = sshll.u32 %s2805_s10, 4  ;;  %s304_s23 = int_to_ptr.vmem [resolvable:$true] %s303_s23 }
  0x70   : > { %s2616_s16 = scalar_lea.vmem %s304_s23, 4096  ;;  %p2624_p3 = scmp.lt.s32.totalorder %s304_s23, %s304_s23 }
  0x71   : > { %p2617_p11 = scmp.ne.s32.totalorder %s304_s23, %s2616_s16  ;;  %p2625_p6 = scmp.lt.s32.totalorder %s2616_s16, %s2616_s16 }
  0x73   : > { %p2619_p2 = pnand %p2617_p11, %p3362_p12  ;;  %p2626_p5 = por %p2625_p6, %p2624_p3 }
  0x75   : > { %p2620_p1 = pneg %p2619_p2 }
  0x77   : > { %p2627_p10 = pnand %p2626_p5, %p2620_p1 }
  0x79   : > { %2630 = shalt.err (!%p2627_p10)
}
  0x7a   : > { %2402 = dma.hbm_to_vmem [thread:$0]  (!%p3360_p7), %s3324_s6, 4096, %s304_s23, [#allocation12], %s3340_s19, %s3340_s19, %s3341_s26  }
  0x7b   : > { %s3363_s24 = sshll.u32 %s2793_s30, 7  ;;  %s3364_s10 = sshll.u32 %s2943_s14, 3 }
  0x7c   : > { %s3026_s25 = scalar_lea.hbm %s3318_s0, %s3363_s24  ;;  %s321_s15 = scalar_lea.vmem [#allocation2], %s3364_s10 }
  0x7d   : > { %s328_s16 = sshll.u32 %s321_s15, 4  ;;  %s2155_s20 = sshll.u32 %s2793_s30, 9  ;;  %s329_s16 = int_to_ptr.vmem [resolvable:$true] %s328_s16 }
  0x7e   : > { %s318_s3 = scalar_lea.sflag [#allocation3], %s2943_s14  ;;  %s2631_s1 = scalar_lea.hbm %s3026_s25, 128 }
  0x7f   : > { %p2632_p4 = scmp.ne.s32.totalorder %s3026_s25, %s2631_s1  ;;  %s2636_s9 = scalar_lea.hbm %s3318_s0, 256 }
  0x80   : > { %p2637_p9 = scmp.lt.s32.totalorder %s3026_s25, %s3318_s0  ;;  %p2638_p11 = scmp.lt.s32.totalorder %s2636_s9, %s2631_s1 }
  0x81   : > { %p2634_p8 = pnand %p2632_p4, %p2976_p0 }
  0x82   : > { %p2639_p12 = por %p2638_p11, %p2637_p9 }
  0x83   : > { %p2635_p7 = pneg %p2634_p8 }
  0x85   : > { %p2640_p2 = pnand %p2639_p12, %p2635_p7 }
  0x87   : > { %2643 = shalt.err (!%p2640_p2)
}
  0x88   : > { %s2644_s10 = scalar_lea.vmem %s329_s16, 128  ;;  %s2806_s14 = smov [#allocation2]  }
  0x89   : > { %p2645_p1 = scmp.ne.s32.totalorder %s329_s16, %s2644_s10  ;;  %s2649_s15 = sshll.u32 %s2806_s14, 4  ;;  %s2650_s15 = int_to_ptr.vmem [resolvable:$false] %s2649_s15 }
  0x8a   : > { %s2651_s26 = scalar_lea.vmem %s2650_s15, 256  ;;  %p2652_p5 = scmp.lt.s32.totalorder %s329_s16, %s2650_s15 }
  0x8b   : > { %p2647_p3 = pnand %p2645_p1, %p2976_p0  ;;  %p2653_p10 = scmp.lt.s32.totalorder %s2651_s26, %s2644_s10 }
  0x8d   : > { %p2648_p6 = pneg %p2647_p3  ;;  %p2654_p4 = por %p2653_p10, %p2652_p5 }
  0x8f   : > { %p2655_p8 = pnand %p2654_p4, %p2648_p6 }
  0x91   : > { %2658 = shalt.err (!%p2655_p8)
}
  0x92   : > { %2406 = dma.hbm_to_vmem [thread:$0]  (!%p2955_p13), %s3026_s25, 128, %s329_s16, %s318_s3  }
  0x93   : > { %s363_s23 = scalar_lea.hbm %s3320_s2, %s2155_s20  ;;  %s2664_s26 = scalar_lea.hbm %s3320_s2, 1024 }
  0x94   : > { %s2659_s9 = scalar_lea.hbm %s363_s23, 512  ;;  %p2665_p12 = scmp.lt.s32.totalorder %s363_s23, %s3320_s2 }
  0x95   : > { %p2660_p7 = scmp.ne.s32.totalorder %s363_s23, %s2659_s9  ;;  %p2666_p2 = scmp.lt.s32.totalorder %s2664_s26, %s2659_s9 }
  0x97   : > { %p2662_p9 = pnand %p2660_p7, %p2976_p0  ;;  %p2667_p1 = por %p2666_p2, %p2665_p12 }
  0x99   : > { %p2663_p11 = pneg %p2662_p9 }
  0x9b   : > { %p2668_p3 = pnand %p2667_p1, %p2663_p11 }
  0x9d   : > { %2671 = shalt.err (!%p2668_p3)
}
  0x9e   : > { %s2672_s25 = scalar_lea.vmem %s2997_s21, 512  ;;  %s2807_s16 = smov [#allocation7]  }
  0x9f   : > { %p2673_p6 = scmp.ne.s32.totalorder %s2997_s21, %s2672_s25  ;;  %s2677_s20 = sshll.u32 %s2807_s16, 4  ;;  %s2678_s20 = int_to_ptr.vmem [resolvable:$false] %s2677_s20 }
  0xa0   : > { %s2679_s3 = scalar_lea.vmem %s2678_s20, 1024  ;;  %p2680_p4 = scmp.lt.s32.totalorder %s2997_s21, %s2678_s20 }
  0xa1   : > { %p2675_p5 = pnand %p2673_p6, %p2976_p0  ;;  %p2681_p8 = scmp.lt.s32.totalorder %s2679_s3, %s2672_s25 }
  0xa3   : > { %p2676_p10 = pneg %p2675_p5  ;;  %p2682_p7 = por %p2681_p8, %p2680_p4 }
  0xa5   : > { %p2683_p9 = pnand %p2682_p7, %p2676_p10 }
  0xa7   : > { %2686 = shalt.err (!%p2683_p9)
}
  0xa8   : > { %s3365_s15 = smov 8   ;;  %s3366_s1 = smov 128  }
  0xa9   : > { %2412 = dma.hbm_to_vmem [thread:$0]  (!%p2955_p13), %s363_s23, 512, %s2997_s21, %s2970_s5, %s3366_s1, %s3366_s1, %s3365_s15  }
  0xaa   : > { %p3367_p0 = scmp.ne.s32.totalorder %s3346_s12, 0 }
  0xab   : > { %s3074_s29 = sand.u32 (!%p3367_p0), 1, %s2785_s28   ;;  %p3368_p11 = scmp.ne.s32.totalorder (!%p3367_p0), %s3352_s17, 0 }
  0xac   : > { %376 = sbr.rel (%p3367_p0) target bundleno = 2574 (0xa0e), region = 48  ;;  %s3077_s19 = sshll.u32 (!%p3367_p0), %s3074_s29, 3 }
  0xad   : > { %s379_s9 = scalar_lea.sflag (!%p3367_p0), [#allocation3], %s3074_s29  ;;  %s382_s22 = scalar_lea.vmem (!%p3367_p0), [#allocation2], %s3077_s19 }
  0xb1   : > { %2756 = dma.done.wait (%p3368_p11), %s379_s9, 128  }
  0xb2   : > { %2758 = vsyncadd (%p3368_p11), %s379_s9, 4294967168  ;;  %s387_s5 = sand.u32 1, %s2883_s11   ;;  %s391_s21 = scalar_lea.vmem [#allocation5], %s3077_s19 }
  0xb3   : > { %s388_s12 = scalar_lea.sflag [#allocation6], %s387_s5 }
  0xb4   : > { %2760 = dma.done.wait (%p3368_p11), %s388_s12, 640  }
  0xb5   : > { %2762 = vsyncadd (%p3368_p11), %s388_s12, 4294966656  ;;  %s2125_s23 = sshll.u32 %s3074_s29, 5  ;;  %p3369_p13 = scmp.eq.s32.totalorder %s2883_s11, 0 }
  0xb6   : > { %s3094_s24 = scalar_lea.vmem [#allocation7], %s2125_s23 }
  0xb7   : > { %2764 = dma.done.wait (%p3369_p13), [#allocation9], 8192   ;;  %p3370_p12 = pmov %p3369_p13 }
  0xb9   : > { %2766 = vsyncadd (%p3370_p12), [#allocation9], 4294959104  ;;  %p3371_p2 = pmov %p3370_p12 }
  0xbb   : > { %2768 = dma.done.wait (%p3371_p2), [#allocation12], 8192   ;;  %p3372_p1 = pmov %p3371_p2 }
  0xbc   : > { %v2808_v0 = vmov 0.0   ;;  %vm2809_vm0 = vmmov 0   ;;  %v511_v1 = vld [vmem:[#allocation8 + $0x170] sm:$0xff]  ;;  %v510_v2 = vld [vmem:[#allocation8 + $0x168] sm:$0xff]  ;;  %v508_v3 = vld [vmem:[#allocation8 + $0x158] sm:$0xff]  ;;  %s2810_s17 = smov 32  }
  0xbd   : > { %2770 = vsyncadd (%p3372_p1), [#allocation12], 4294959104  ;;  %2245 = vmatprep.subr.mxu1 %v2808_v0  ;;  %577 = vmatprep.mubr.f32.mxu0 %v2808_v0  ;;  %v507_v4 = vld [vmem:[#allocation8 + $0x150] sm:$0xff]  ;;  %v505_v5 = vld [vmem:[#allocation8 + $0x140] sm:$0xff]  ;;  %s2811_s13 = smov 64   ;;  %s2812_s26 = smov 96  }
  0xbe   : > { %2277 = vmatprep.mubr.msk.f32.mxu1 %vm2809_vm0, %v2808_v0  ;;  %513 = vmatprep.subr.mxu0 %v511_v1  ;;  %v512_v6 = vld [vmem:[#allocation8 + $0x178] sm:$0xff]  ;;  %v509_v8 = vld [vmem:[#allocation8 + $0x160] sm:$0xff]  ;;  %v502_v9 = vld [vmem:[#allocation8 + $0x128] sm:$0xff]  ;;  %vm660_vm1 = vcmask 261120   ;;  %vm667_vm2 = vcmask 523264   ;;  %vm994_vm4 = vcmask 64512  }
  0xbf   : > { %514 = vmatpush1.msra.mxu0 %v510_v2  ;;  %v504_v7 = vld [vmem:[#allocation8 + $0x138] sm:$0xff]  ;;  %2246 = vmatpush3.msra.mxu1 %v512_v6  ;;  %v506_v10 = vld [vmem:[#allocation8 + $0x148] sm:$0xff]  ;;  %v501_v11 = vld [vmem:[#allocation8 + $0x120] sm:$0xff]  ;;  %s3197_s10 = scalar_lea.vmem [#allocation15], %s2125_s23  ;;  %s2156_s14 = sshll.u32 %s2883_s11, 9 }
  0xc0   : > { %515 = vmatprep.subr.mxu0 %v508_v3  ;;  %2247 = vmatprep.subr.mxu1 %v2808_v0  ;;  %v499_v12 = vld [vmem:[#allocation8 + $0x110] sm:$0xff]  ;;  %v498_v14 = vld [vmem:[#allocation8 + $0x108] sm:$0xff]  ;;  %v496_v15 = vld [vmem:[#allocation8 + $0xf8] sm:$0xff]  ;;  %s1922_s25 = sshll.u32 %s3197_s10, 4  ;;  %s3255_s3 = scalar_lea.hbm %s3326_s8, %s2156_s14  ;;  %s3257_s25 = int_to_ptr.vmem [resolvable:$true] %s1922_s25 }
  0xc1   : > { %516 = vmatpush1.msra.mxu0 %v507_v4  ;;  %2248 = vmatpush3.msra.mxu1 %v509_v8  ;;  %v503_v13 = vld [vmem:[#allocation8 + $0x130] sm:$0xff]  ;;  %v500_v16 = vld [vmem:[#allocation8 + $0x118] sm:$0xff]  ;;  %v493_v18 = vld [vmem:[#allocation8 + $0xe0] sm:$0xff]  ;;  %s1896_s15 = scalar_lea.sflag [#allocation16], %s3074_s29  ;;  %s2687_s1 = scalar_lea.vmem %s3257_s25, 512 }
  0xc2   : > { %517 = vmatprep.subr.mxu0 %v505_v5  ;;  %2249 = vmatprep.subr.mxu1 %v2808_v0  ;;  %v495_v17 = vld [vmem:[#allocation8 + $0xf0] sm:$0xff]  ;;  %v497_v19 = vld [vmem:[#allocation8 + $0x100] sm:$0xff]  ;;  %v492_v20 = vld [vmem:[#allocation8 + $0xd8] sm:$0xff]  ;;  %p2688_p3 = scmp.ne.s32.totalorder %s3257_s25, %s2687_s1  ;;  %p3373_p6 = scmp.ne.s32.totalorder %s3353_s18, 0 }
  0xc3   : > { %518 = vmatpush1.msra.mxu0 %v504_v7  ;;  %2250 = vmatpush3.msra.mxu1 %v506_v10  ;;  %v490_v21 = vld [vmem:[#allocation8 + $0xc8] sm:$0xff]  ;;  %v489_v23 = vld [vmem:[#allocation8 + $0xc0] sm:$0xff]  ;;  %v487_v24 = vld [vmem:[#allocation8 + $0xb0] sm:$0xff]  ;;  %s2813_s9 = smov [#allocation15]  }
  0xc4   : > { %519 = vmatprep.subr.mxu0 %v502_v9  ;;  %2251 = vmatprep.subr.mxu1 %v2808_v0  ;;  %v494_v22 = vld [vmem:[#allocation8 + $0xe8] sm:$0xff]  ;;  %v491_v25 = vld [vmem:[#allocation8 + $0xd0] sm:$0xff]  ;;  %v484_v27 = vld [vmem:[#allocation8 + $0x98] sm:$0xff]  ;;  %p2689_p5 = pnand %p2688_p3, %p3373_p6 }
  0xc5   : > { %520 = vmatpush1.msra.mxu0 %v501_v11  ;;  %2252 = vmatpush3.msra.mxu1 %v503_v13  ;;  %v486_v26 = vld [vmem:[#allocation8 + $0xa8] sm:$0xff]  ;;  %v488_v28 = vld [vmem:[#allocation8 + $0xb8] sm:$0xff]  ;;  %v483_v29 = vld [vmem:[#allocation8 + $0x90] sm:$0xff] }
  0xc6   : > { %521 = vmatprep.subr.mxu0 %v499_v12  ;;  %2253 = vmatprep.subr.mxu1 %v2808_v0  ;;  %v481_v30 = vld [vmem:[#allocation8 + $0x80] sm:$0xff]  ;;  %v480_v32 = vld [vmem:[#allocation8 + $0x78] sm:$0xff]  ;;  %v478_v33 = vld [vmem:[#allocation8 + $0x68] sm:$0xff]  ;;  %p2690_p10 = pneg %p2689_p5 }
  0xc7   : > { %522 = vmatpush1.msra.mxu0 %v498_v14  ;;  %2254 = vmatpush3.msra.mxu1 %v500_v16  ;;  %v485_v31 = vld [vmem:[#allocation8 + $0xa0] sm:$0xff]  ;;  %v482_v34 = vld [vmem:[#allocation8 + $0x88] sm:$0xff]  ;;  %v475_v36 = vld [vmem:[#allocation8 + $0x50] sm:$0xff] }
  0xc8   : > { %523 = vmatprep.subr.mxu0 %v496_v15  ;;  %2255 = vmatprep.subr.mxu1 %v2808_v0  ;;  %v477_v35 = vld [vmem:[#allocation8 + $0x60] sm:$0xff]  ;;  %v479_v37 = vld [vmem:[#allocation8 + $0x70] sm:$0xff]  ;;  %v474_v38 = vld [vmem:[#allocation8 + $0x48] sm:$0xff] }
  0xc9   : > { %524 = vmatpush1.msra.mxu0 %v495_v17  ;;  %2256 = vmatpush3.msra.mxu1 %v497_v19  ;;  %v472_v39 = vld [vmem:[#allocation8 + $0x38] sm:$0xff]  ;;  %v471_v41 = vld [vmem:[#allocation8 + $0x30] sm:$0xff]  ;;  %v469_v42 = vld [vmem:[#allocation8 + $0x20] sm:$0xff] }
  0xca   : > { %525 = vmatprep.subr.mxu0 %v493_v18  ;;  %2257 = vmatprep.subr.mxu1 %v2808_v0  ;;  %v476_v40 = vld [vmem:[#allocation8 + $0x58] sm:$0xff]  ;;  %v473_v43 = vld [vmem:[#allocation8 + $0x40] sm:$0xff]  ;;  %v466_v45 = vld [vmem:[#allocation8 + $0x8] sm:$0xff] }
  0xcb   : > { %526 = vmatpush1.msra.mxu0 %v492_v20  ;;  %2258 = vmatpush3.msra.mxu1 %v494_v22  ;;  %v468_v44 = vld [vmem:[#allocation8 + $0x18] sm:$0xff]  ;;  %v470_v46 = vld [vmem:[#allocation8 + $0x28] sm:$0xff]  ;;  %v465_v47 = vld [vmem:[#allocation8] sm:$0xff] }
  0xcc   : > { %527 = vmatprep.subr.mxu0 %v490_v21  ;;  %2259 = vmatprep.subr.mxu1 %v2808_v0  ;;  %v3123_v48 = vld [vmem:[%s382_s22] sm:$0xff]  ;;  %v467_v49 = vld [vmem:[#allocation8 + $0x10] sm:$0xff]  ;;  %v677_v15 = vld [vmem:[%s3094_s24 + $0x18] sm:$0xff]  ;;  %s2691_s22 = sshll.u32 %s2813_s9, 4  ;;  %s2692_s22 = int_to_ptr.vmem [resolvable:$false] %s2691_s22 }
  0xcd   : > { %528 = vmatpush1.msra.mxu0 %v489_v23  ;;  %2260 = vmatpush3.msra.mxu1 %v491_v25  ;;  %v671_v2 = vld [vmem:[%s391_s21] sm:$0xff]  ;;  %v674_v4 = vld [vmem:[%s3094_s24] sm:$0xff]  ;;  %v675_v11 = vld [vmem:[%s3094_s24 + $0x8] sm:$0xff]  ;;  %s2693_s5 = scalar_lea.vmem %s2692_s22, 1024  ;;  %p2694_p4 = scmp.lt.s32.totalorder %s3257_s25, %s2692_s22 }
  0xce   : > { %529 = vmatprep.subr.mxu0 %v487_v24  ;;  %2261 = vmatprep.subr.mxu1 %v2808_v0  ;;  %vm672_vm3 = vcmp.gt.f32.partialorder %v671_v2, 0.5  ;;  %v676_v12 = vld [vmem:[%s3094_s24 + $0x10] sm:$0xff]  ;;  %p2695_p8 = scmp.lt.s32.totalorder %s2693_s5, %s2687_s1 }
  0xcf   : > { %530 = vmatpush1.msra.mxu0 %v486_v26  ;;  %2262 = vmatpush3.msra.mxu1 %v488_v28  ;;  %v673_v3 = vsel %vm672_vm3, -1e+09, %v2808_v0 }
  0xd0   : > { %531 = vmatprep.subr.mxu0 %v484_v27  ;;  %2263 = vmatprep.subr.mxu1 %v2808_v0  ;;  %v678_v5 = vadd.f32 %v674_v4, %v673_v3  ;;  %v679_v13 = vadd.f32 %v675_v11, %v673_v3  ;;  %v680_v17 = vadd.f32 %v676_v12, %v673_v3  ;;  %v1352_v11 = vld [vmem:[#allocation10 + $0x28] sm:$0xff]  ;;  %v1347_v12 = vld [vmem:[#allocation10] sm:$0xff]  ;;  %p2696_p7 = por %p2695_p8, %p2694_p4 }
  0xd1   : > { %532 = vmatpush1.msra.mxu0 %v483_v29  ;;  %2264 = vmatpush3.msra.mxu1 %v485_v31  ;;  %v681_v22 = vadd.f32 %v677_v15, %v673_v3 }
  0xd2   : > { %533 = vmatprep.subr.mxu0 %v481_v30  ;;  %2265 = vmatprep.subr.mxu1 %v2808_v0  ;;  %p2697_p9 = pnand %p2696_p7, %p2690_p10 }
  0xd3   : > { %534 = vmatpush1.msra.mxu0 %v480_v32  ;;  %2266 = vmatpush3.msra.mxu1 %v482_v34 }
  0xd4   : > { %535 = vmatprep.subr.mxu0 %v478_v33  ;;  %2267 = vmatprep.subr.mxu1 %v2808_v0 }
  0xd5   : > { %536 = vmatpush1.msra.mxu0 %v477_v35  ;;  %2268 = vmatpush3.msra.mxu1 %v479_v37 }
  0xd6   : > { %537 = vmatprep.subr.mxu0 %v475_v36  ;;  %2269 = vmatprep.subr.mxu1 %v2808_v0 }
  0xd7   : > { %538 = vmatpush1.msra.mxu0 %v474_v38  ;;  %2270 = vmatpush3.msra.mxu1 %v476_v40 }
  0xd8   : > { %539 = vmatprep.subr.mxu0 %v472_v39  ;;  %2271 = vmatprep.subr.mxu1 %v2808_v0 }
  0xd9   : > { %540 = vmatpush1.msra.mxu0 %v471_v41  ;;  %2272 = vmatpush3.msra.mxu1 %v473_v43 }
  0xda   : > { %541 = vmatprep.subr.mxu0 %v469_v42  ;;  %2273 = vmatprep.subr.mxu1 %v2808_v0 }
  0xdb   : > { %542 = vmatpush1.msra.mxu0 %v468_v44  ;;  %2274 = vmatpush3.msra.mxu1 %v470_v46 }
  0xdc   : > { %543 = vmatprep.subr.mxu0 %v466_v45  ;;  %2275 = vmatprep.subr.mxu1 %v2808_v0 }
  0xdd   : > { %544 = vmatpush1.msra.mxu0 %v465_v47  ;;  %2276 = vmatpush3.msra.mxu1 %v467_v49 }
  0xde   : > { %578 = vmatmul.mubr.f32.vlgmr.msra.gmra.mxu0 %v3123_v48  ;;  %2278 = vmatmul.mubr.f32.vlgmr.msra.gmra.mxu1 %v3123_v48 }
  0xdf   : > { %2280 = vmatprep.subr.mxu0 %v2808_v0  ;;  %2282 = vmatprep.mubr.msk.f32.mxu0 %vm2809_vm0, %v2808_v0 }
  0xe0   : > { %2285 = vmatprep.subr.mxu1 %v2808_v0  ;;  %2287 = vmatprep.mubr.msk.f32.mxu1 %vm2809_vm0, %v2808_v0 }
 0x19e   : > { %v3135_v50 = vpop.f32.mrf.mxu0  ;;  %v650_v51 = vpop.f32.mrf.mxu1 }
 0x19f   : > { %656 = vrot.lane.b32.xlu0 %v3135_v50, %s2810_s17 }
 0x1a0   : > { %v581_v52 = vpop.f32.mrf.mxu0  ;;  %v2279_v53 = vpop.f32.mrf.mxu1 }
 0x1a1   : > { %663 = vrot.lane.b32.xlu1 %v581_v52, %s2811_s13 }
 0x1a3   : > { %658 = vrot.lane.b32.xlu0 %v581_v52, %s2810_s17 }
 0x1a5   : > { %665 = vrot.lane.b32.xlu1 %v650_v51, %s2811_s13 }
 0x1a7   : > { %669 = vrot.lane.b32.xlu0 %v650_v51, %s2812_s26 }
 0x1a9   : > { %682 = vrot.lane.b32.xlu1 %v3135_v50, %s2812_s26 }
 0x211   : > { %v657_v54 = vpop.permute.xlu0 %656 }
 0x213   : > { %v664_v55 = vpop.permute.xlu1 %663 }
 0x215   : > { %v659_v56 = vpop.permute.xlu0 %658 }
 0x216   : > { %v661_v57 = vsel %vm660_vm1, %v657_v54, %v659_v56 }
 0x217   : > { %v666_v58 = vpop.permute.xlu1 %665  ;;  %758 = vrot.lane.b32.xlu0 %v661_v57, %s2812_s26 }
 0x218   : > { %v3142_v59 = vsel %vm667_vm2, %v664_v55, %v666_v58 }
 0x219   : > { %834 = vrot.lane.b32.xlu1 %v3142_v59, %s2812_s26  ;;  %v3145_v60 = vpop.permute.xlu0 %669 }
 0x21b   : > { %v683_v61 = vpop.permute.xlu1 %682  ;;  %910 = vrot.lane.b32.xlu0 %v3145_v60, %s2812_s26 }
 0x21c   : > { %2281 = vmatpush3.xpose.msk.msra.mxu0 %vm660_vm1, %v683_v61 }
 0x21d   : > { %2290 = vmatprep.subr.mxu0 %v2808_v0 }
 0x21f   : > { %2283 = vmatmul.mubr.msk.f32.vlgmr.msra.gmra.mxu0 %vm660_vm1, %v3135_v50 }
 0x220   : > { %2292 = vmatprep.mubr.msk.f32.mxu0 %vm2809_vm0, %v2808_v0 }
 0x289   : > { %v759_v62 = vpop.permute.xlu0 %758 }
 0x28a   : > { %2286 = vmatpush3.xpose.msk.msra.mxu1 %vm660_vm1, %v759_v62 }
 0x28b   : > { %v835_v63 = vpop.permute.xlu1 %834  ;;  %2295 = vmatprep.subr.mxu1 %v2808_v0 }
 0x28c   : > { %2291 = vmatpush3.xpose.msk.msra.mxu0 %vm660_vm1, %v835_v63 }
 0x28d   : > { %2288 = vmatmul.mubr.msk.f32.vlgmr.msra.gmra.mxu1 %vm660_vm1, %v661_v57  ;;  %v911_v1 = vpop.permute.xlu0 %910  ;;  %2300 = vmatprep.subr.mxu0 %v2808_v0 }
 0x28e   : > { %2296 = vmatpush3.xpose.msk.msra.mxu1 %vm660_vm1, %v911_v1  ;;  %2297 = vmatprep.mubr.msk.f32.mxu1 %vm2809_vm0, %v2808_v0 }
 0x28f   : > { %2293 = vmatmul.mubr.msk.f32.vlgmr.msra.gmra.mxu0 %vm660_vm1, %v3142_v59  ;;  %2305 = vmatprep.subr.mxu1 %v2808_v0 }
 0x290   : > { %2302 = vmatprep.mubr.msk.f32.mxu0 %vm2809_vm0, %v2808_v0 }
 0x291   : > { %2298 = vmatmul.mubr.msk.f32.vlgmr.msra.gmra.mxu1 %vm660_vm1, %v3145_v60 }
 0x292   : > { %2307 = vmatprep.mubr.msk.f32.mxu1 %vm2809_vm0, %v2808_v0 }
 0x2df   : > { %v754_v6 = vpop.f32.mrf.mxu0 }
 0x2e0   : > { %v986_v7 = vmul.f32 0.17677669, %v754_v6 }
 0x2e1   : > { %v2284_v8 = vpop.f32.mrf.mxu0 }
 0x2e2   : > { %v990_v9 = vadd.f32 %v986_v7, %v678_v5  ;;  %v1354_v5 = vld [vmem:[#allocation10 + $0x38] sm:$0xff]  ;;  %v1349_v8 = vld [vmem:[#allocation10 + $0x10] sm:$0xff] }
 0x2e3   : > { %v1350_v7 = vld [vmem:[#allocation10 + $0x18] sm:$0xff] }
 0x2e4   : > { %v995_v10 = vsel %vm994_vm4, %v990_v9, -inf }
 0x2e5   : > { %996 = vmax.xlane.f32.xlu1 %v995_v10  ;;  %v1348_v10 = vld [vmem:[#allocation10 + $0x8] sm:$0xff] }
 0x34d   : > { %v830_v14 = vpop.f32.mrf.mxu1 }
 0x34e   : > { %v987_v16 = vmul.f32 0.17677669, %v830_v14  ;;  %v1358_v14 = vld [vmem:[#allocation10 + $0x58] sm:$0xff] }
 0x34f   : > { %v2289_v18 = vpop.f32.mrf.mxu1  ;;  %v906_v19 = vpop.f32.mrf.mxu0 }
 0x350   : > { %v988_v20 = vmul.f32 0.17677669, %v906_v19  ;;  %v991_v21 = vadd.f32 %v987_v16, %v679_v13  ;;  %v1351_v13 = vld [vmem:[#allocation10 + $0x20] sm:$0xff]  ;;  %v1357_v16 = vld [vmem:[#allocation10 + $0x50] sm:$0xff]  ;;  %v1356_v18 = vld [vmem:[#allocation10 + $0x48] sm:$0xff] }
 0x351   : > { %v2294_v23 = vpop.f32.mrf.mxu0  ;;  %v982_v24 = vpop.f32.mrf.mxu1  ;;  %v1355_v19 = vld [vmem:[#allocation10 + $0x40] sm:$0xff] }
 0x352   : > { %v989_v25 = vmul.f32 0.17677669, %v982_v24  ;;  %v998_v26 = vsel %vm994_vm4, %v991_v21, -inf  ;;  %v992_v27 = vadd.f32 %v988_v20, %v680_v17  ;;  %v1362_v20 = vld [vmem:[#allocation10 + $0x78] sm:$0xff]  ;;  %v1360_v24 = vld [vmem:[#allocation10 + $0x68] sm:$0xff] }
 0x353   : > { %999 = vmax.xlane.f32.xlu0 %v998_v26  ;;  %v2299_v28 = vpop.f32.mrf.mxu1 }
 0x354   : > { %v993_v29 = vadd.f32 %v989_v25, %v681_v22  ;;  %v1001_v30 = vsel %vm994_vm4, %v992_v27, -inf  ;;  %v1361_v22 = vld [vmem:[#allocation10 + $0x70] sm:$0xff] }
 0x356   : > { %v1004_v31 = vsel %vm994_vm4, %v993_v29, -inf }
 0x357   : > { %1002 = vmax.xlane.f32.xlu0 %v1001_v30  ;;  %1005 = vmax.xlane.f32.xlu1 %v1004_v31 }
 0x368   : > { %1119 = vrot.lane.b32.xlu1 %v661_v57, %s2811_s13 }
 0x36e   : > { %v997_v32 = vpop.xlane.xlu1 %996 }
 0x36f   : > { %v1007_v33 = vsub.f32 %v990_v9, %v997_v32  ;;  %v1353_v9 = vld [vmem:[#allocation10 + $0x30] sm:$0xff] }
 0x371   : > { %v1011_v34 = vmul.f32 1.442695, %v1007_v33 }
 0x373   : > { %2479 = vpow2.f32 %v1011_v34 }
 0x380   : > { %v2480_v35 = vpop.eup %2479 }
 0x381   : > { %v1019_v36 = vsel %vm994_vm4, %v2480_v35, 0.0 }
 0x382   : > { %1020 = vadd.xlane.f32.xlu0 %v1019_v36 }
 0x398   : > { %1043 = vrot.lane.b32.xlu0 %v3135_v50, %s2811_s13 }
 0x3dc   : > { %v1000_v37 = vpop.xlane.xlu0 %999 }
 0x3dd   : > { %v1008_v38 = vsub.f32 %v991_v21, %v1000_v37 }
 0x3df   : > { %v1013_v39 = vmul.f32 1.442695, %v1008_v38 }
 0x3e0   : > { %v1006_v40 = vpop.xlane.xlu1 %1005  ;;  %v1003_v41 = vpop.xlane.xlu0 %1002 }
 0x3e1   : > { %2481 = vpow2.f32 %v1013_v39  ;;  %v1010_v42 = vsub.f32 %v993_v29, %v1006_v40  ;;  %v1009_v43 = vsub.f32 %v992_v27, %v1003_v41  ;;  %v1359_v27 = vld [vmem:[#allocation10 + $0x60] sm:$0xff] }
 0x3e3   : > { %v1017_v44 = vmul.f32 1.442695, %v1010_v42  ;;  %v1015_v45 = vmul.f32 1.442695, %v1009_v43  ;;  %v1702_v42 = vld [vmem:[#allocation11 + $0xf8] sm:$0xff]  ;;  %v1701_v43 = vld [vmem:[#allocation11 + $0xf0] sm:$0xff] }
 0x3e4   : > { %v1120_v46 = vpop.permute.xlu1 %1119 }
 0x3e5   : > { %2483 = vpow2.f32 %v1017_v44  ;;  %2306 = vmatpush3.msra.mxu1 %v1120_v46  ;;  %v1699_v44 = vld [vmem:[#allocation11 + $0xe0] sm:$0xff]  ;;  %v1697_v46 = vld [vmem:[#allocation11 + $0xd0] sm:$0xff] }
 0x3e6   : > { %2485 = vpow2.f32 %v1015_v45  ;;  %2315 = vmatprep.subr.mxu1 %v2808_v0  ;;  %v1698_v45 = vld [vmem:[#allocation11 + $0xd8] sm:$0xff] }
 0x3ee   : > { %v2482_v47 = vpop.eup %2481 }
 0x3ef   : > { %v1022_v49 = vsel %vm994_vm4, %v2482_v47, 0.0 }
 0x3f0   : > { %1023 = vadd.xlane.f32.xlu1 %v1022_v49  ;;  %v1695_v49 = vld [vmem:[#allocation11 + $0xc0] sm:$0xff] }
 0x3f2   : > { %v2484_v50 = vpop.eup %2483 }
 0x3f3   : > { %v2486_v51 = vpop.eup %2485  ;;  %v1028_v52 = vsel %vm994_vm4, %v2484_v50, 0.0 }
 0x3f4   : > { %1029 = vadd.xlane.f32.xlu1 %v1028_v52  ;;  %v1025_v53 = vsel %vm994_vm4, %v2486_v51, 0.0  ;;  %v1691_v52 = vld [vmem:[#allocation11 + $0xa0] sm:$0xff] }
 0x3f5   : > { %1026 = vadd.xlane.f32.xlu0 %v1025_v53 }
 0x405   : > { %1195 = vrot.lane.b32.xlu1 %v3142_v59, %s2811_s13 }
 0x40b   : > { %1271 = vrot.lane.b32.xlu0 %v3145_v60, %s2811_s13  ;;  %v1021_v54 = vpop.xlane.xlu0 %1020 }
 0x40c   : > { %2487 = vrcp.f32 %v1021_v54 }
 0x40f   : > { %v1044_v55 = vpop.permute.xlu0 %1043 }
 0x410   : > { %2301 = vmatpush3.msra.mxu0 %v1044_v55 }
 0x411   : > { %2310 = vmatprep.subr.mxu0 %v2808_v0 }
 0x419   : > { %v2488_v56 = vpop.eup %2487 }
 0x41a   : > { %v1035_v57 = vmul.f32 %v2488_v56, %v2480_v35 }
 0x41c   : > { %1039 = vst.msk [vmem:[%s3197_s10] sm:$0xff] %vm994_vm4, %v1035_v57  ;;  %2303 = vmatmul.mubr.msk.f32.vlgmr.msra.gmra.mxu0 %vm994_vm4, %v1035_v57  ;;  %v1690_v57 = vld [vmem:[#allocation11 + $0x98] sm:$0xff] }
 0x41d   : > { %2312 = vmatprep.mubr.msk.f32.mxu0 %vm2809_vm0, %v2808_v0 }
 0x479   : > { %v1024_v58 = vpop.xlane.xlu1 %1023 }
 0x47a   : > { %2489 = vrcp.f32 %v1024_v58  ;;  %v1689_v58 = vld [vmem:[#allocation11 + $0x90] sm:$0xff] }
 0x47d   : > { %v1030_v59 = vpop.xlane.xlu1 %1029 }
 0x47e   : > { %2491 = vrcp.f32 %v1030_v59  ;;  %v1027_v60 = vpop.xlane.xlu0 %1026  ;;  %v1688_v59 = vld [vmem:[#allocation11 + $0x88] sm:$0xff] }
 0x47f   : > { %2493 = vrcp.f32 %v1027_v60  ;;  %v1687_v60 = vld [vmem:[#allocation11 + $0x80] sm:$0xff] }
 0x481   : > { %v1196_v61 = vpop.permute.xlu1 %1195 }
 0x482   : > { %2311 = vmatpush3.msra.mxu0 %v1196_v61  ;;  %v1272_v1 = vpop.permute.xlu0 %1271  ;;  %v1686_v61 = vld [vmem:[#allocation11 + $0x78] sm:$0xff] }
 0x483   : > { %2320 = vmatprep.subr.mxu0 %v2808_v0 }
 0x487   : > { %v2490_v62 = vpop.eup %2489 }
 0x488   : > { %v1036_v63 = vmul.f32 %v2490_v62, %v2482_v47  ;;  %v1696_v47 = vld [vmem:[#allocation11 + $0xc8] sm:$0xff]  ;;  %v1685_v62 = vld [vmem:[#allocation11 + $0x70] sm:$0xff] }
 0x48a   : > { %1040 = vst.msk [vmem:[%s3197_s10 + $0x8] sm:$0xff] %vm994_vm4, %v1036_v63  ;;  %2308 = vmatmul.mubr.msk.f32.vlgmr.msra.gmra.mxu1 %vm994_vm4, %v1036_v63  ;;  %v1684_v63 = vld [vmem:[#allocation11 + $0x68] sm:$0xff] }
 0x48b   : > { %v2492_v2 = vpop.eup %2491  ;;  %2316 = vmatpush3.msra.mxu1 %v1272_v1  ;;  %2317 = vmatprep.mubr.msk.f32.mxu1 %vm2809_vm0, %v2808_v0  ;;  %v1683_v1 = vld [vmem:[#allocation11 + $0x60] sm:$0xff] }
 0x48c   : > { %v2494_v3 = vpop.eup %2493  ;;  %v1038_v4 = vmul.f32 %v2492_v2, %v2484_v50  ;;  %2331 = vmatprep.subr.mxu1 %v2808_v0  ;;  %v1694_v50 = vld [vmem:[#allocation11 + $0xb8] sm:$0xff] }
 0x48d   : > { %v1037_v6 = vmul.f32 %v2494_v3, %v2486_v51  ;;  %v1693_v51 = vld [vmem:[#allocation11 + $0xb0] sm:$0xff]  ;;  %v1682_v2 = vld [vmem:[#allocation11 + $0x58] sm:$0xff] }
 0x48e   : > { %1042 = vst.msk [vmem:[%s3197_s10 + $0x18] sm:$0xff] %vm994_vm4, %v1038_v4  ;;  %2318 = vmatmul.mubr.msk.f32.vlgmr.msra.gmra.mxu1 %vm994_vm4, %v1038_v4  ;;  %v1681_v3 = vld [vmem:[#allocation11 + $0x50] sm:$0xff]  ;;  %v1680_v4 = vld [vmem:[#allocation11 + $0x48] sm:$0xff] }
 0x48f   : > { %1041 = vst.msk [vmem:[%s3197_s10 + $0x10] sm:$0xff] %vm994_vm4, %v1037_v6  ;;  %2313 = vmatmul.mubr.msk.f32.vlgmr.msra.gmra.mxu0 %vm994_vm4, %v1037_v6  ;;  %2332 = vmatpush3.msra.mxu1 %v1354_v5  ;;  %v1679_v5 = vld [vmem:[#allocation11 + $0x40] sm:$0xff]  ;;  %v1678_v6 = vld [vmem:[#allocation11 + $0x38] sm:$0xff] }
 0x490   : > { %2321 = vmatpush3.msra.mxu0 %v1350_v7  ;;  %2328 = vmatprep.mubr.msk.f32.mxu0 %vm2809_vm0, %v2808_v0  ;;  %v1677_v7 = vld [vmem:[#allocation11 + $0x30] sm:$0xff] }
 0x491   : > { %2322 = vmatprep.subr.mxu0 %v2808_v0  ;;  %2333 = vmatprep.subr.mxu1 %v2808_v0 }
 0x492   : > { %2323 = vmatpush3.msra.mxu0 %v1349_v8  ;;  %2334 = vmatpush3.msra.mxu1 %v1353_v9  ;;  %v1676_v8 = vld [vmem:[#allocation11 + $0x28] sm:$0xff]  ;;  %v1675_v9 = vld [vmem:[#allocation11 + $0x20] sm:$0xff] }
 0x493   : > { %2324 = vmatprep.subr.mxu0 %v2808_v0  ;;  %2335 = vmatprep.subr.mxu1 %v2808_v0 }
 0x494   : > { %2325 = vmatpush3.msra.mxu0 %v1348_v10  ;;  %2336 = vmatpush3.msra.mxu1 %v1352_v11  ;;  %v1674_v10 = vld [vmem:[#allocation11 + $0x18] sm:$0xff]  ;;  %v1673_v11 = vld [vmem:[#allocation11 + $0x10] sm:$0xff] }
 0x495   : > { %2326 = vmatprep.subr.mxu0 %v2808_v0  ;;  %2337 = vmatprep.subr.mxu1 %v2808_v0 }
 0x496   : > { %2327 = vmatpush3.msra.mxu0 %v1347_v12  ;;  %2338 = vmatpush3.msra.mxu1 %v1351_v13  ;;  %v1672_v12 = vld [vmem:[#allocation11 + $0x8] sm:$0xff]  ;;  %v1671_v13 = vld [vmem:[#allocation11] sm:$0xff] }
 0x497   : > { %2342 = vmatprep.subr.mxu0 %v2808_v0  ;;  %2339 = vmatprep.mubr.msk.f32.mxu1 %vm2809_vm0, %v2808_v0 }
 0x498   : > { %2353 = vmatprep.subr.mxu1 %v2808_v0 }
 0x4dc   : > { %v1115_v15 = vpop.f32.mrf.mxu0 }
 0x4dd   : > { %2329 = vmatmul.mubr.msk.f32.vlgmr.msra.gmra.mxu0 %vm660_vm1, %v1115_v15  ;;  %v1791_v15 = vld [vmem:[#allocation13 + $0x78] sm:$0xff] }
 0x4de   : > { %v2304_v17 = vpop.f32.mrf.mxu0  ;;  %2343 = vmatpush3.msra.mxu0 %v1358_v14  ;;  %2350 = vmatprep.mubr.msk.f32.mxu0 %vm2809_vm0, %v2808_v0  ;;  %v1807_v14 = vld [vmem:[#allocation13 + $0xf8] sm:$0xff] }
 0x4df   : > { %2344 = vmatprep.subr.mxu0 %v2808_v0  ;;  %v1790_v17 = vld [vmem:[#allocation13 + $0x70] sm:$0xff] }
 0x4e0   : > { %2345 = vmatpush3.msra.mxu0 %v1357_v16  ;;  %v1806_v16 = vld [vmem:[#allocation13 + $0xf0] sm:$0xff] }
 0x4e1   : > { %2346 = vmatprep.subr.mxu0 %v2808_v0 }
 0x4e2   : > { %2347 = vmatpush3.msra.mxu0 %v1356_v18  ;;  %v1805_v18 = vld [vmem:[#allocation13 + $0xe8] sm:$0xff] }
 0x4e3   : > { %2348 = vmatprep.subr.mxu0 %v2808_v0 }
 0x4e4   : > { %2349 = vmatpush3.msra.mxu0 %v1355_v19  ;;  %v1789_v19 = vld [vmem:[#allocation13 + $0x68] sm:$0xff] }
 0x4e5   : > { %1703 = vmatprep.subr.mxu0 %v1702_v42 }
 0x54a   : > { %v1191_v21 = vpop.f32.mrf.mxu1 }
 0x54b   : > { %2340 = vmatmul.mubr.msk.f32.vlgmr.msra.gmra.mxu1 %vm660_vm1, %v1191_v21  ;;  %v1788_v21 = vld [vmem:[#allocation13 + $0x60] sm:$0xff] }
 0x54c   : > { %2354 = vmatpush3.msra.mxu1 %v1362_v20  ;;  %v2309_v23 = vpop.f32.mrf.mxu1  ;;  %2361 = vmatprep.mubr.msk.f32.mxu1 %vm2809_vm0, %v2808_v0  ;;  %v1804_v20 = vld [vmem:[#allocation13 + $0xe0] sm:$0xff] }
 0x54d   : > { %2355 = vmatprep.subr.mxu1 %v2808_v0  ;;  %v1787_v23 = vld [vmem:[#allocation13 + $0x58] sm:$0xff] }
 0x54e   : > { %2356 = vmatpush3.msra.mxu1 %v1361_v22  ;;  %v1343_v25 = vpop.f32.mrf.mxu1  ;;  %v1803_v22 = vld [vmem:[#allocation13 + $0xd8] sm:$0xff] }
 0x54f   : > { %v1267_v26 = vpop.f32.mrf.mxu0  ;;  %2357 = vmatprep.subr.mxu1 %v2808_v0 }
 0x550   : > { %2351 = vmatmul.mubr.msk.f32.vlgmr.msra.gmra.mxu0 %vm660_vm1, %v1267_v26  ;;  %2358 = vmatpush3.msra.mxu1 %v1360_v24  ;;  %v2319_v28 = vpop.f32.mrf.mxu1  ;;  %v1802_v24 = vld [vmem:[#allocation13 + $0xd0] sm:$0xff]  ;;  %v1801_v26 = vld [vmem:[#allocation13 + $0xc8] sm:$0xff] }
 0x551   : > { %v2314_v29 = vpop.f32.mrf.mxu0  ;;  %2359 = vmatprep.subr.mxu1 %v2808_v0  ;;  %1767 = vmatprep.mubr.f32.mxu0 %v2808_v0  ;;  %v1700_v0 = vld [vmem:[#allocation11 + $0xe8] sm:$0xff]  ;;  %v1800_v28 = vld [vmem:[#allocation13 + $0xc0] sm:$0xff] }
 0x552   : > { %2360 = vmatpush3.msra.mxu1 %v1359_v27  ;;  %1704 = vmatpush1.msra.mxu0 %v1701_v43  ;;  %v1785_v27 = vld [vmem:[#allocation13 + $0x48] sm:$0xff]  ;;  %v1784_v29 = vld [vmem:[#allocation13 + $0x40] sm:$0xff] }
 0x553   : > { %2362 = vmatmul.mubr.msk.f32.vlgmr.msra.gmra.mxu1 %vm660_vm1, %v1343_v25  ;;  %1705 = vmatprep.subr.mxu0 %v1700_v0  ;;  %v1786_v25 = vld [vmem:[#allocation13 + $0x50] sm:$0xff] }
 0x554   : > { %1706 = vmatpush1.msra.mxu0 %v1699_v44  ;;  %2210 = vmatprep.subr.mxu1 %v1807_v14  ;;  %v1794_v44 = vld [vmem:[#allocation13 + $0x90] sm:$0xff] }
 0x555   : > { %1707 = vmatprep.subr.mxu0 %v1698_v45  ;;  %2211 = vmatpush3.msra.mxu1 %v1791_v15  ;;  %v1778_v45 = vld [vmem:[#allocation13 + $0x10] sm:$0xff] }
 0x556   : > { %1708 = vmatpush1.msra.mxu0 %v1697_v46  ;;  %2212 = vmatprep.subr.mxu1 %v1806_v16  ;;  %v1793_v46 = vld [vmem:[#allocation13 + $0x88] sm:$0xff] }
 0x557   : > { %1709 = vmatprep.subr.mxu0 %v1696_v47  ;;  %2213 = vmatpush3.msra.mxu1 %v1790_v17  ;;  %v1777_v47 = vld [vmem:[#allocation13 + $0x8] sm:$0xff] }
 0x558   : > { %1710 = vmatpush1.msra.mxu0 %v1695_v49  ;;  %2214 = vmatprep.subr.mxu1 %v1805_v18  ;;  %v1792_v49 = vld [vmem:[#allocation13 + $0x80] sm:$0xff] }
 0x559   : > { %1711 = vmatprep.subr.mxu0 %v1694_v50  ;;  %2215 = vmatpush3.msra.mxu1 %v1789_v19  ;;  %v1776_v50 = vld [vmem:[#allocation13] sm:$0xff] }
 0x55a   : > { %1712 = vmatpush1.msra.mxu0 %v1693_v51  ;;  %2216 = vmatprep.subr.mxu1 %v1804_v20 }
 0x55b   : > { %2217 = vmatpush3.msra.mxu1 %v1788_v21 }
 0x55c   : > { %2218 = vmatprep.subr.mxu1 %v1803_v22 }
 0x55d   : > { %2219 = vmatpush3.msra.mxu1 %v1787_v23 }
 0x55e   : > { %2220 = vmatprep.subr.mxu1 %v1802_v24 }
 0x55f   : > { %2221 = vmatpush3.msra.mxu1 %v1786_v25 }
 0x560   : > { %2222 = vmatprep.subr.mxu1 %v1801_v26 }
 0x561   : > { %2223 = vmatpush3.msra.mxu1 %v1785_v27 }
 0x562   : > { %2224 = vmatprep.subr.mxu1 %v1800_v28 }
 0x563   : > { %2225 = vmatpush3.msra.mxu1 %v1784_v29 }
 0x59d   : > { %v1432_v30 = vpop.f32.mrf.mxu0 }
 0x59f   : > { %v2330_v31 = vpop.f32.mrf.mxu0 }
 0x5a0   : > { %v1783_v31 = vld [vmem:[#allocation13 + $0x38] sm:$0xff] }
 0x60b   : > { %v1505_v32 = vpop.f32.mrf.mxu1 }
 0x60c   : > { %v1655_v34 = vadd.f32 %v1505_v32, %v1432_v30  ;;  %v1799_v30 = vld [vmem:[#allocation13 + $0xb8] sm:$0xff]  ;;  %v1798_v32 = vld [vmem:[#allocation13 + $0xb0] sm:$0xff] }
 0x60d   : > { %v2341_v33 = vpop.f32.mrf.mxu1  ;;  %2226 = vmatprep.subr.mxu1 %v1799_v30 }
 0x60e   : > { %v1782_v33 = vld [vmem:[#allocation13 + $0x30] sm:$0xff]  ;;  %2227 = vmatpush3.msra.mxu1 %v1783_v31 }
 0x60f   : > { %2228 = vmatprep.subr.mxu1 %v1798_v32 }
 0x610   : > { %v1578_v35 = vpop.f32.mrf.mxu0  ;;  %2229 = vmatpush3.msra.mxu1 %v1782_v33 }
 0x611   : > { %v1656_v36 = vadd.f32 %v1655_v34, %v1578_v35  ;;  %v1797_v34 = vld [vmem:[#allocation13 + $0xa8] sm:$0xff] }
 0x612   : > { %v2352_v37 = vpop.f32.mrf.mxu0  ;;  %v1781_v35 = vld [vmem:[#allocation13 + $0x28] sm:$0xff]  ;;  %2230 = vmatprep.subr.mxu1 %v1797_v34 }
 0x613   : > { %v1651_v38 = vpop.f32.mrf.mxu1  ;;  %v1780_v37 = vld [vmem:[#allocation13 + $0x20] sm:$0xff]  ;;  %2231 = vmatpush3.msra.mxu1 %v1781_v35 }
 0x614   : > { %v1657_v39 = vadd.f32 %v1656_v36, %v1651_v38  ;;  %v1796_v36 = vld [vmem:[#allocation13 + $0xa0] sm:$0xff]  ;;  %v1795_v38 = vld [vmem:[#allocation13 + $0x98] sm:$0xff] }
 0x615   : > { %v2363_v40 = vpop.f32.mrf.mxu1  ;;  %2232 = vmatprep.subr.mxu1 %v1796_v36 }
 0x616   : > { %v1658_v41 = vadd.f32 %v1657_v39, %v3123_v48  ;;  %v1692_v48 = vld [vmem:[#allocation11 + $0xa8] sm:$0xff]  ;;  %v1779_v39 = vld [vmem:[#allocation13 + $0x18] sm:$0xff]  ;;  %2233 = vmatpush3.msra.mxu1 %v1780_v37 }
 0x617   : > { %1713 = vmatprep.subr.mxu0 %v1692_v48  ;;  %2234 = vmatprep.subr.mxu1 %v1795_v38 }
 0x618   : > { %1659 = vadd.xlane.f32.xlu1 %v1658_v41  ;;  %1714 = vmatpush1.msra.mxu0 %v1691_v52 }
 0x619   : > { %1715 = vmatprep.subr.mxu0 %v1690_v57  ;;  %2235 = vmatpush3.msra.mxu1 %v1779_v39 }
 0x61a   : > { %1716 = vmatpush1.msra.mxu0 %v1689_v58  ;;  %2236 = vmatprep.subr.mxu1 %v1794_v44 }
 0x61b   : > { %1717 = vmatprep.subr.mxu0 %v1688_v59  ;;  %2237 = vmatpush3.msra.mxu1 %v1778_v45 }
 0x61c   : > { %1718 = vmatpush1.msra.mxu0 %v1687_v60  ;;  %2238 = vmatprep.subr.mxu1 %v1793_v46 }
 0x61d   : > { %1719 = vmatprep.subr.mxu0 %v1686_v61  ;;  %2239 = vmatpush3.msra.mxu1 %v1777_v47 }
 0x61e   : > { %1720 = vmatpush1.msra.mxu0 %v1685_v62  ;;  %2240 = vmatprep.subr.mxu1 %v1792_v49 }
 0x61f   : > { %1721 = vmatprep.subr.mxu0 %v1684_v63  ;;  %2241 = vmatpush3.msra.mxu1 %v1776_v50 }
 0x620   : > { %1722 = vmatpush1.msra.mxu0 %v1683_v1 }
 0x621   : > { %1723 = vmatprep.subr.mxu0 %v1682_v2 }
 0x622   : > { %1724 = vmatpush1.msra.mxu0 %v1681_v3 }
 0x623   : > { %1725 = vmatprep.subr.mxu0 %v1680_v4 }
 0x624   : > { %1726 = vmatpush1.msra.mxu0 %v1679_v5 }
 0x625   : > { %1727 = vmatprep.subr.mxu0 %v1678_v6 }
 0x626   : > { %1728 = vmatpush1.msra.mxu0 %v1677_v7 }
 0x627   : > { %1729 = vmatprep.subr.mxu0 %v1676_v8 }
 0x628   : > { %1730 = vmatpush1.msra.mxu0 %v1675_v9 }
 0x629   : > { %1731 = vmatprep.subr.mxu0 %v1674_v10 }
 0x62a   : > { %1732 = vmatpush1.msra.mxu0 %v1673_v11 }
 0x62b   : > { %1733 = vmatprep.subr.mxu0 %v1672_v12 }
 0x62c   : > { %1734 = vmatpush1.msra.mxu0 %v1671_v13 }
 0x6a1   : > { %v1660_v53 = vpop.xlane.xlu1 %1659 }
 0x6a2   : > { %v1662_v54 = vmul.f32 0.0078125, %v1660_v53 }
 0x6a4   : > { %v3245_v55 = vsub.f32 %v1658_v41, %v1662_v54 }
 0x6a6   : > { %v1664_v56 = vmul.f32 %v3245_v55, %v3245_v55 }
 0x6a8   : > { %1665 = vadd.xlane.f32.xlu0 %v1664_v56 }
 0x731   : > { %v1666_v40 = vpop.xlane.xlu0 %1665 }
 0x732   : > { %v1667_v41 = vmul.f32 0.0078125, %v1666_v40 }
 0x734   : > { %v1668_v42 = vadd.f32 1e-05, %v1667_v41 }
 0x736   : > { %2495 = vrsqrt.f32 %v1668_v42 }
 0x743   : > { %v2496_v43 = vpop.eup %2495 }
 0x744   : > { %v1670_v0 = vmul.f32 %v2496_v43, %v3245_v55 }
 0x746   : > { %1768 = vmatmul.mubr.f32.vlgmr.msra.gmra.mxu0 %v1670_v0 }
 0x806   : > { %v1769_v51 = vpop.f32.mrf.mxu0 }
 0x807   : > { %v1774_v53 = vmax.f32 %v1769_v51, 0.0 }
 0x808   : > { %v1771_v48 = vpop.f32.mrf.mxu0 }
 0x809   : > { %v1775_v52 = vmax.f32 %v1771_v48, 0.0 }
 0x80b   : > { %1872 = vmatprep.mubr.f32.mxu1 %v1775_v52 }
 0x80c   : > { %1873 = vmatmul.mubr.f32.vlgmr.msra.gmra.mxu1 %v1774_v53 }
 0x8cc   : > { %v2242_v54 = vpop.f32.mrf.mxu1 }
 0x8ce   : > { %v2243_v55 = vpop.f32.mrf.mxu1 }
 0x8cf   : > { %v2244_v56 = vadd.f32 %v2243_v55, %v2242_v54 }
 0x8d1   : > { %v1875_v57 = vadd.f32 %v2244_v56, %v1670_v0 }
 0x8d3   : > { %1878 = vadd.xlane.f32.xlu0 %v1875_v57 }
 0x95c   : > { %v1879_v58 = vpop.xlane.xlu0 %1878 }
 0x95d   : > { %v1880_v59 = vmul.f32 0.0078125, %v1879_v58 }
 0x95f   : > { %v1881_v60 = vsub.f32 %v1875_v57, %v1880_v59 }
 0x961   : > { %v1882_v61 = vmul.f32 %v1881_v60, %v1881_v60 }
 0x963   : > { %1883 = vadd.xlane.f32.xlu1 %v1882_v61 }
 0x964   : > { %2700 = shalt.err (!%p2697_p9)
}
 0x965   : > { %s2701_s12 = scalar_lea.hbm %s3255_s3, 512  ;;  %s2705_s24 = scalar_lea.hbm %s3326_s8, 1024 }
 0x966   : > { %p2702_p0 = scmp.ne.s32.totalorder %s3255_s3, %s2701_s12  ;;  %p2706_p12 = scmp.lt.s32.totalorder %s3255_s3, %s3326_s8 }
 0x967   : > { %p2707_p2 = scmp.lt.s32.totalorder %s2705_s24, %s2701_s12 }
 0x968   : > { %p2703_p11 = pnand %p2702_p0, %p3373_p6 }
 0x969   : > { %p2708_p1 = por %p2707_p2, %p2706_p12 }
 0x96a   : > { %p2704_p13 = pneg %p2703_p11 }
 0x96c   : > { %p2709_p3 = pnand %p2708_p1, %p2704_p13 }
 0x96e   : > { %2712 = shalt.err (!%p2709_p3)
}
 0x96f   : > { %s2814_s26 = smov 128   ;;  %s2815_s10 = smov 8  }
 0x970   : > { %2387 = dma.vmem_to_hbm [thread:$0]  (%p3373_p6), %s3257_s25, 512, %s3255_s3, %s1896_s15, %s2814_s26, %s2814_s26, %s2815_s10  }
 0x971   : > { %s2150_s14 = sshll.u32 %s2883_s11, 7  ;;  %s456_s16 = scalar_lea.vmem [#allocation14], %s3077_s19 }
 0x972   : > { %s1909_s20 = sshll.u32 %s456_s16, 4  ;;  %s1907_s22 = scalar_lea.hbm %s3325_s7, %s2150_s14  ;;  %s1910_s20 = int_to_ptr.vmem [resolvable:$true] %s1909_s20 }
 0x973   : > { %s1891_s5 = scalar_lea.sflag [#allocation4], %s3074_s29  ;;  %s2713_s12 = scalar_lea.vmem %s1910_s20, 128 }
 0x974   : > { %p2714_p5 = scmp.ne.s32.totalorder %s1910_s20, %s2713_s12  ;;  %s2816_s25 = smov [#allocation14]  }
 0x975   : > { %s2717_s3 = sshll.u32 %s2816_s25, 4  ;;  %s2718_s3 = int_to_ptr.vmem [resolvable:$false] %s2717_s3 }
 0x976   : > { %p2715_p10 = pnand %p2714_p5, %p3373_p6  ;;  %s2719_s11 = scalar_lea.vmem %s2718_s3, 256 }
 0x977   : > { %p2720_p8 = scmp.lt.s32.totalorder %s1910_s20, %s2718_s3  ;;  %p2721_p7 = scmp.lt.s32.totalorder %s2719_s11, %s2713_s12 }
 0x978   : > { %p2716_p4 = pneg %p2715_p10 }
 0x979   : > { %p2722_p9 = por %p2721_p7, %p2720_p8 }
 0x97b   : > { %p2723_p0 = pnand %p2722_p9, %p2716_p4 }
 0x9ec   : > { %v1884_v62 = vpop.xlane.xlu1 %1883 }
 0x9ed   : > { %v1885_v63 = vmul.f32 0.0078125, %v1884_v62 }
 0x9ef   : > { %v1886_v1 = vadd.f32 1e-05, %v1885_v63 }
 0x9f1   : > { %2497 = vrsqrt.f32 %v1886_v1 }
 0x9fe   : > { %v2498_v2 = vpop.eup %2497 }
 0x9ff   : > { %v1888_v3 = vmul.f32 %v2498_v2, %v1881_v60 }
 0xa01   : > { %1889 = vst [vmem:[%s456_s16] sm:$0xff] %v1888_v3 }
 0xa02   : > { %2726 = shalt.err (!%p2723_p0)
}
 0xa03   : > { %s2727_s19 = scalar_lea.hbm %s1907_s22, 128  ;;  %s2731_s21 = scalar_lea.hbm %s3325_s7, 256 }
 0xa04   : > { %p2728_p11 = scmp.ne.s32.totalorder %s1907_s22, %s2727_s19  ;;  %p2732_p2 = scmp.lt.s32.totalorder %s1907_s22, %s3325_s7 }
 0xa05   : > { %p2733_p1 = scmp.lt.s32.totalorder %s2731_s21, %s2727_s19 }
 0xa06   : > { %p2729_p13 = pnand %p2728_p11, %p3373_p6 }
 0xa07   : > { %p2734_p3 = por %p2733_p1, %p2732_p2 }
 0xa08   : > { %p2730_p12 = pneg %p2729_p13 }
 0xa0a   : > { %p2735_p5 = pnand %p2734_p3, %p2730_p12 }
 0xa0c   : > { %2738 = shalt.err (!%p2735_p5)
}
 0xa0d   : > { %2386 = dma.vmem_to_hbm [thread:$0]  (%p3373_p6), %s1910_s20, 128, %s1907_s22, %s1891_s5  }
 0xa0e PF: > { %s3374_s17 = sld [smem:[#allocation26_spill]]  ;;  %s1937_s13 = sand.u32 1, %s2781_s27  }
 0xa0f   : > { %p3376_p4 = scmp.ge.s32.totalorder %s2793_s30, 2  ;;  %s1938_s26 = scalar_lea.sflag [#allocation4], %s1937_s13 }
 0xa14   : > { %p3375_p10 = scmp.ne.s32.totalorder %s3374_s17, 0 }
 0xa16   : > { %p2414_p8 = pnand %p3376_p4, %p3375_p10 }
 0xa18   : > { %p2415_p7 = pneg %p2414_p8 }
 0xa1a   : > { %2772 = dma.done.wait (%p2415_p7), %s1938_s26, 128  }
 0xa1b   : > { %2774 = vsyncadd (%p2415_p7), %s1938_s26, 4294967168  ;;  %s1947_s10 = scalar_lea.sflag [#allocation16], %s1937_s13 }
 0xa1c   : > { %2776 = dma.done.wait (%p2415_p7), %s1947_s10, 512  }
 0xa1d   : > { %2778 = vsyncadd (%p2415_p7), %s1947_s10, 4294966784  ;;  %s3377_s30 = sld [smem:[#allocation24_spill]]  ;;  %s3380_s27 = smov %s2785_s28 }
 0xa1e   : > { %s3378_s14 = sld [smem:[#allocation23_spill]] }
 0xa1f   : > { %s3379_s29 = sld [smem:[#allocation25_spill]] }
 0xa23   : > { %p30_p6 = scmp.ge.s32.totalorder %s3377_s30, 4  }
 0xa24   : > { %s3381_s28 = smov %s3378_s14 }
 0xa25   :  { %32 = sbr.rel (!%p30_p6) target bundleno = 15 (0xf), region = 150 }
 0xa2a   :  { %1952 = vsyncpa [#allocation3], 1 }
 0xa2b   :  { %1954 = vsyncpa [#allocation3 + $0x1], 1 }
 0xa2c   :  { %1955 = vsyncpa [#allocation6], 1 }
 0xa2d   :  { %1957 = vsyncpa [#allocation6 + $0x1], 1 }
 0xa2e   :  { %1958 = vsyncpa [#allocation9], 1 }
 0xa2f   :  { %1959 = vsyncpa [#allocation12], 1 }
 0xa30   :  { %1960 = vsyncpa [#allocation4], 1 }
 0xa31   :  { %1962 = vsyncpa [#allocation4 + $0x1], 1 }
 0xa32   :  { %1963 = vsyncpa [#allocation16], 1 }
 0xa33   :  { %1965 = vsyncpa [#allocation16 + $0x1], 1 }

</bundles_post_ra>
